<compile_context>
chip_gen: v7x
topology: tpu7x:2x2x1
jax: 0.10.0
libtpu: 0.0.40
codegen_flags: <defaults>
</compile_context>

<pallas_src>
import jax
import jax.numpy as jnp
import numpy as np
from jax.experimental import pallas as pl
from jax.experimental.pallas import tpu as pltpu

H = W = 14          # module hardcodes .view(B, 1, 14, 14)
P = H * W           # 196 image positions
CI = 512            # backbone output channels
CH = 128            # head channels


def avol_kernel(img_ref, aud_ref,
                w56t_ref, b56_ref,
                wfc1_ref, bfc1_ref, wfc2_ref, bfc2_ref,
                fus_ref,
                out_ref, loc_ref):
    # ---- audio head, batched over the TB samples in this block -------------
    # aud_ref is lane-dense (TB, S, CI); AdaptiveMaxPool2d(1) == max over S.
    pooled = jnp.max(aud_ref[...], axis=1)                          # (TB, CI)
    h = jnp.dot(pooled, wfc1_ref[...],
                preferred_element_type=jnp.float32) + bfc1_ref[...]
    h = jnp.maximum(h, 0.0)                                         # relu(aud_fc1)
    a = jnp.dot(h, wfc2_ref[...],
                preferred_element_type=jnp.float32) + bfc2_ref[...]  # (TB, CH)

    # ---- image branch + fusion, algebraically folded ------------------------
    # im_conv6(im_conv5(F))[:,p] = W56^T F[:,p] + b56   (1x1 convs, no act between)
    # sp[b,p] = a[b] . (W56^T F[b,:,p] + b56)
    #         = (a[b] @ W56^T) . F[b,:,p] + a[b] . b56
    v = jnp.dot(a, w56t_ref[...],
                preferred_element_type=jnp.float32)                  # (TB, CI)
    bias_a = jnp.sum(a * b56_ref[...], axis=-1, keepdims=True)       # (TB, 1)

    # Batched 512-matvec on the VPU (broadcast-multiply + channel-axis sum):
    # avoids TB single-row MXU matmuls that would each reload a 512x196 RHS.
    sp = jnp.sum(v[:, :, None] * img_ref[...], axis=1) + bias_a      # (TB, P)

    # ---- fus_conv7 (1x1, 1->1 channel) + sigmoid ----------------------------
    w7 = fus_ref[0]
    b7 = fus_ref[1]
    loc = jax.nn.sigmoid(w7 * sp + b7)                               # (TB, P)

    loc_ref[...] = loc.astype(loc_ref.dtype)                         # lane-dense store
    # fus_pool: AdaptiveMaxPool2d(1) == global max over the 14x14 map
    out_ref[...] = jnp.max(loc, axis=-1, keepdims=True).astype(out_ref.dtype)


def init_params(key):
    ks = jax.random.split(key, 9)
    s = 0.05
    return {
        # 1x1 conv weights stored as (C_in, C_out) so y = x @ W + b
        "w5":   jax.random.normal(ks[0], (CI, CH), jnp.float32) * s,
        "b5":   jax.random.normal(ks[1], (1, CH), jnp.float32) * s,
        "w6":   jax.random.normal(ks[2], (CH, CH), jnp.float32) * s,
        "b6":   jax.random.normal(ks[3], (1, CH), jnp.float32) * s,
        "wfc1": jax.random.normal(ks[4], (CI, CH), jnp.float32) * s,
        "bfc1": jax.random.normal(ks[5], (1, CH), jnp.float32) * s,
        "wfc2": jax.random.normal(ks[6], (CH, CH), jnp.float32) * s,
        "bfc2": jax.random.normal(ks[7], (1, CH), jnp.float32) * s,
        # fus_conv7: Conv2d(1,1,1) -> scalar weight + scalar bias
        "fus":  jax.random.normal(ks[8], (2,), jnp.float32) * s,
    }


def avolnet_forward(img_feat, aud_feat, p, tb=32):
    """img_feat: (B,512,14,14) NCHW f32, aud_feat: (B,512,Ha,Wa) NCHW f32."""
    B = img_feat.shape[0]
    S = aud_feat.shape[2] * aud_feat.shape[3]

    TB = min(tb, B)
    Bp = -(-B // TB) * TB                 # pad batch up to a multiple of TB

    # Image features channel-major (B, CI, P): a pure reshape of NCHW, no copy.
    img_ccp = img_feat.reshape(B, CI, P)
    # Audio features lane-dense (B, S, CI): 512 channels on the 128-lane axis.
    # TODO(synk): in a real pipeline AudioConvNet would emit this layout (NHWC)
    #             directly instead of this small wrapper transpose.
    aud_sc = jnp.transpose(aud_feat.reshape(B, CI, S), (0, 2, 1))

    if Bp != B:
        pad = Bp - B
        img_ccp = jnp.pad(img_ccp, ((0, pad), (0, 0), (0, 0)))
        aud_sc = jnp.pad(aud_sc, ((0, pad), (0, 0), (0, 0)))

    # Fuse im_conv5/im_conv6 (exact: no activation between them in the module).
    w56 = p["w5"] @ p["w6"]                        # (CI, CH)
    b56 = p["b5"] @ p["w6"] + p["b6"]              # (1, CH)
    w56t = jnp.transpose(w56)                      # (CH, CI)

    grid_spec = pltpu.PrefetchScalarGridSpec(
        num_scalar_prefetch=0,
        grid=(Bp // TB,),
        in_specs=[
            pl.BlockSpec((TB, CI, P), lambda b: (b, 0, 0)),      # img features f32
            pl.BlockSpec((TB, S, CI), lambda b: (b, 0, 0)),      # aud features f32
            pl.BlockSpec((CH, CI), lambda b: (0, 0)),            # W56^T
            pl.BlockSpec((1, CH), lambda b: (0, 0)),             # b56
            pl.BlockSpec((CI, CH), lambda b: (0, 0)),            # wfc1
            pl.BlockSpec((1, CH), lambda b: (0, 0)),             # bfc1
            pl.BlockSpec((CH, CH), lambda b: (0, 0)),            # wfc2
            pl.BlockSpec((1, CH), lambda b: (0, 0)),             # bfc2
            pl.BlockSpec(memory_space=pltpu.MemorySpace.SMEM),   # fus (w7, b7)
        ],
        out_specs=[
            pl.BlockSpec((TB, 1), lambda b: (b, 0)),             # out (per-sample max)
            pl.BlockSpec((TB, P), lambda b: (b, 0)),             # loc (lane-dense)
        ],
    )

    out2, loc2 = pl.pallas_call(
        avol_kernel,
        out_shape=(
            jax.ShapeDtypeStruct((Bp, 1), jnp.float32),
            jax.ShapeDtypeStruct((Bp, P), jnp.float32),
        ),
        grid_spec=grid_spec,
        compiler_params=pltpu.CompilerParams(
            dimension_semantics=("parallel",),
            # ~37 MB needed at TB=32 (f32, 196->256 lane padding on img blocks);
            # 48 MiB fits v7x's 64 MiB physical VMEM with headroom.
            vmem_limit_bytes=48 * 1024 * 1024,
        ),
    )(img_ccp, aud_sc,
      w56t, b56, p["wfc1"], p["bfc1"], p["wfc2"], p["bfc2"],
      p["fus"])

    out = jnp.squeeze(out2[:B])              # matches torch .squeeze() -> (B,)
    loc = loc2[:B].reshape(B, 1, H, W)       # matches .view(B, 1, 14, 14)
    return out, loc


def reference_forward(img_feat, aud_feat, p):
    """Pure-JAX f32 reference of the same head (true module semantics)."""
    B = img_feat.shape[0]
    img = jnp.transpose(img_feat, (0, 2, 3, 1)).reshape(B, P, CI)
    x = img @ p["w5"] + p["b5"]
    x = x @ p["w6"] + p["b6"]
    aud = jnp.max(aud_feat, axis=(2, 3))                   # AdaptiveMaxPool2d(1)
    h = jax.nn.relu(aud @ p["wfc1"] + p["bfc1"][0])
    a = h @ p["wfc2"] + p["bfc2"][0]
    sp = jnp.einsum("bpc,bc->bp", x, a)
    loc = jax.nn.sigmoid(p["fus"][0] * sp + p["fus"][1])
    out = jnp.max(loc, axis=1)
    return out, loc.reshape(B, 1, H, W)


if __name__ == "__main__":
    key = jax.random.PRNGKey(0)
    k_img, k_aud, k_par = jax.random.split(key, 3)

    B = 2
    img_feat = jax.random.normal(k_img, (B, CI, H, W), jnp.float32)   # ImageConvNet output
    aud_feat = jax.random.normal(k_aud, (B, CI, 4, 4), jnp.float32)   # AudioConvNet output
    params = init_params(k_par)

    out, loc = avolnet_forward(img_feat, aud_feat, params)
    jax.block_until_ready((out, loc))

    out_ref, loc_ref = reference_forward(img_feat, aud_feat, params)
    assert out.shape == (B,) and loc.shape == (B, 1, H, W)
    # f32 end-to-end; remaining divergence is only default-vs-MXU matmul
    # precision, so 1e-2 tolerances are very conservative.
    np.testing.assert_allclose(np.asarray(out), np.asarray(out_ref), atol=1e-2, rtol=1e-2)
    np.testing.assert_allclose(np.asarray(loc), np.asarray(loc_ref), atol=1e-2, rtol=1e-2)

    print("KERNEL_OK")
</pallas_src>

<mosaic_0001>
module attributes {stable_mosaic.version = 11 : i64} {
  func.func @avol_kernel(%arg0: i32, %arg1: memref<2x512x196xf32, #tpu.memory_space<vmem>>, %arg2: memref<2x16x512xf32, #tpu.memory_space<vmem>>, %arg3: memref<128x512xf32, #tpu.memory_space<vmem>>, %arg4: memref<1x128xf32, #tpu.memory_space<vmem>>, %arg5: memref<512x128xf32, #tpu.memory_space<vmem>>, %arg6: memref<1x128xf32, #tpu.memory_space<vmem>>, %arg7: memref<128x128xf32, #tpu.memory_space<vmem>>, %arg8: memref<1x128xf32, #tpu.memory_space<vmem>>, %arg9: memref<2xf32, #tpu.memory_space<smem>>, %arg10: memref<2x1xf32, #tpu.memory_space<vmem>>, %arg11: memref<2x196xf32, #tpu.memory_space<vmem>>) attributes {dimension_semantics = [#tpu.dimension_semantics<parallel>], iteration_bounds = array<i64: 1>, scalar_prefetch = 0 : i64, scratch_operands = 0 : i64, tpu.core_type = #tpu.core_type<tc>, window_params = [{transform_indices = @transform_0, window_bounds = array<i64: 2, 512, 196>}, {transform_indices = @transform_1, window_bounds = array<i64: 2, 16, 512>}, {pipeline_mode = #tpu.pipeline_mode<synchronous>, transform_indices = @transform_2, window_bounds = array<i64: 128, 512>}, {pipeline_mode = #tpu.pipeline_mode<synchronous>, transform_indices = @transform_3, window_bounds = array<i64: 1, 128>}, {pipeline_mode = #tpu.pipeline_mode<synchronous>, transform_indices = @transform_4, window_bounds = array<i64: 512, 128>}, {pipeline_mode = #tpu.pipeline_mode<synchronous>, transform_indices = @transform_5, window_bounds = array<i64: 1, 128>}, {pipeline_mode = #tpu.pipeline_mode<synchronous>, transform_indices = @transform_6, window_bounds = array<i64: 128, 128>}, {pipeline_mode = #tpu.pipeline_mode<synchronous>, transform_indices = @transform_7, window_bounds = array<i64: 1, 128>}, {transform_indices = @transform_8, window_bounds = array<i64: 2>}, {transform_indices = @transform_9, window_bounds = array<i64: 2, 1>}, {transform_indices = @transform_10, window_bounds = array<i64: 2, 196>}]} {
    %c0 = arith.constant 0 : index
    %c0_0 = arith.constant 0 : index
    %c0_1 = arith.constant 0 : index
    %0 = vector.load %arg2[%c0, %c0_0, %c0_1] : memref<2x16x512xf32, #tpu.memory_space<vmem>>, vector<2x16x512xf32>
    %cst = arith.constant dense<0xFF800000> : vector<2x512xf32>
    %1 = vector.multi_reduction <maximumf>, %0, %cst [1] : vector<2x16x512xf32> to vector<2x512xf32>
    %c0_2 = arith.constant 0 : index
    %c0_3 = arith.constant 0 : index
    %2 = vector.load %arg5[%c0_2, %c0_3] : memref<512x128xf32, #tpu.memory_space<vmem>>, vector<512x128xf32>
    %cst_4 = arith.constant dense<0.000000e+00> : vector<2x128xf32>
    %3 = tpu.matmul %1, %2, %cst_4 {dimension_numbers = #tpu.dot_dimension_numbers<[1], [0], [0], [1], [0, 0, 1, 1], [], []>} : vector<2x512xf32>, vector<512x128xf32>, vector<2x128xf32> -> vector<2x128xf32>
    %c0_5 = arith.constant 0 : index
    %c0_6 = arith.constant 0 : index
    %4 = vector.load %arg6[%c0_5, %c0_6] : memref<1x128xf32, #tpu.memory_space<vmem>>, vector<1x128xf32>
    %5 = vector.broadcast %4 : vector<1x128xf32> to vector<2x128xf32>
    %6 = arith.addf %3, %5 : vector<2x128xf32>
    %cst_7 = arith.constant 0.000000e+00 : f32
    %7 = vector.broadcast %cst_7 : f32 to vector<2x128xf32>
    %8 = arith.maximumf %6, %7 : vector<2x128xf32>
    %c0_8 = arith.constant 0 : index
    %c0_9 = arith.constant 0 : index
    %9 = vector.load %arg7[%c0_8, %c0_9] : memref<128x128xf32, #tpu.memory_space<vmem>>, vector<128x128xf32>
    %cst_10 = arith.constant dense<0.000000e+00> : vector<2x128xf32>
    %10 = tpu.matmul %8, %9, %cst_10 {dimension_numbers = #tpu.dot_dimension_numbers<[1], [0], [0], [1], [0, 0, 1, 1], [], []>} : vector<2x128xf32>, vector<128x128xf32>, vector<2x128xf32> -> vector<2x128xf32>
    %c0_11 = arith.constant 0 : index
    %c0_12 = arith.constant 0 : index
    %11 = vector.load %arg8[%c0_11, %c0_12] : memref<1x128xf32, #tpu.memory_space<vmem>>, vector<1x128xf32>
    %12 = vector.broadcast %11 : vector<1x128xf32> to vector<2x128xf32>
    %13 = arith.addf %10, %12 : vector<2x128xf32>
    %c0_13 = arith.constant 0 : index
    %c0_14 = arith.constant 0 : index
    %14 = vector.load %arg3[%c0_13, %c0_14] : memref<128x512xf32, #tpu.memory_space<vmem>>, vector<128x512xf32>
    %cst_15 = arith.constant dense<0.000000e+00> : vector<2x512xf32>
    %15 = tpu.matmul %13, %14, %cst_15 {dimension_numbers = #tpu.dot_dimension_numbers<[1], [0], [0], [1], [0, 0, 1, 1], [], []>} : vector<2x128xf32>, vector<128x512xf32>, vector<2x512xf32> -> vector<2x512xf32>
    %c0_16 = arith.constant 0 : index
    %c0_17 = arith.constant 0 : index
    %16 = vector.load %arg4[%c0_16, %c0_17] : memref<1x128xf32, #tpu.memory_space<vmem>>, vector<1x128xf32>
    %17 = vector.broadcast %16 : vector<1x128xf32> to vector<2x128xf32>
    %18 = arith.mulf %13, %17 : vector<2x128xf32>
    %cst_18 = arith.constant dense<0.000000e+00> : vector<2xf32>
    %19 = vector.multi_reduction <add>, %18, %cst_18 [1] : vector<2x128xf32> to vector<2xf32>
    %20 = vector.shape_cast %19 : vector<2xf32> to vector<2x1xf32>
    %21 = vector.shape_cast %15 : vector<2x512xf32> to vector<2x512x1xf32>
    %c0_19 = arith.constant 0 : index
    %c0_20 = arith.constant 0 : index
    %c0_21 = arith.constant 0 : index
    %22 = vector.load %arg1[%c0_19, %c0_20, %c0_21] : memref<2x512x196xf32, #tpu.memory_space<vmem>>, vector<2x512x196xf32>
    %23 = vector.broadcast %21 : vector<2x512x1xf32> to vector<2x512x196xf32>
    %24 = arith.mulf %23, %22 : vector<2x512x196xf32>
    %cst_22 = arith.constant dense<0.000000e+00> : vector<2x196xf32>
    %25 = vector.multi_reduction <add>, %24, %cst_22 [1] : vector<2x512x196xf32> to vector<2x196xf32>
    %26 = vector.broadcast %20 : vector<2x1xf32> to vector<2x196xf32>
    %27 = arith.addf %25, %26 : vector<2x196xf32>
    %c0_23 = arith.constant 0 : index
    %28 = memref.load %arg9[%c0_23] : memref<2xf32, #tpu.memory_space<smem>>
    %c1 = arith.constant 1 : index
    %29 = memref.load %arg9[%c1] : memref<2xf32, #tpu.memory_space<smem>>
    %30 = vector.broadcast %28 : f32 to vector<2x196xf32>
    %31 = arith.mulf %30, %27 : vector<2x196xf32>
    %32 = vector.broadcast %29 : f32 to vector<2x196xf32>
    %33 = arith.addf %31, %32 : vector<2x196xf32>
    %34 = arith.negf %33 : vector<2x196xf32>
    %35 = math.exp %34 : vector<2x196xf32>
    %cst_24 = arith.constant 1.000000e+00 : f32
    %36 = vector.broadcast %cst_24 : f32 to vector<2x196xf32>
    %37 = arith.addf %36, %35 : vector<2x196xf32>
    %38 = arith.divf %36, %37 : vector<2x196xf32>
    %c0_25 = arith.constant 0 : index
    %c0_26 = arith.constant 0 : index
    %39 = vector.load %arg11[%c0_25, %c0_26] : memref<2x196xf32, #tpu.memory_space<vmem>>, vector<2x196xf32>
    tpu.vector_store %arg11[%c0_25, %c0_26], %38 {strides = array<i32>} : memref<2x196xf32, #tpu.memory_space<vmem>>, vector<2x196xf32>,
    %cst_27 = arith.constant dense<0xFF800000> : vector<2xf32>
    %40 = vector.multi_reduction <maximumf>, %38, %cst_27 [1] : vector<2x196xf32> to vector<2xf32>
    %41 = vector.shape_cast %40 : vector<2xf32> to vector<2x1xf32>
    %c0_28 = arith.constant 0 : index
    %c0_29 = arith.constant 0 : index
    %42 = vector.load %arg10[%c0_28, %c0_29] : memref<2x1xf32, #tpu.memory_space<vmem>>, vector<2x1xf32>
    tpu.vector_store %arg10[%c0_28, %c0_29], %41 {strides = array<i32>} : memref<2x1xf32, #tpu.memory_space<vmem>>, vector<2x1xf32>,
    return
  }
  func.func @transform_0(%arg0: i32) -> (i32, i32, i32) {
    %c0_i32 = arith.constant 0 : i32
    %c0_i32_0 = arith.constant 0 : i32
    %c0_i32_1 = arith.constant 0 : i32
    return %arg0, %c0_i32, %c0_i32_0 : i32, i32, i32
  }
  func.func @transform_1(%arg0: i32) -> (i32, i32, i32) {
    %c0_i32 = arith.constant 0 : i32
    %c0_i32_0 = arith.constant 0 : i32
    %c0_i32_1 = arith.constant 0 : i32
    return %arg0, %c0_i32, %c0_i32_0 : i32, i32, i32
  }
  func.func @transform_2(%arg0: i32) -> (i32, i32) {
    %c0_i32 = arith.constant 0 : i32
    %c0_i32_0 = arith.constant 0 : i32
    %c0_i32_1 = arith.constant 0 : i32
    return %c0_i32, %c0_i32_0 : i32, i32
  }
  func.func @transform_3(%arg0: i32) -> (i32, i32) {
    %c0_i32 = arith.constant 0 : i32
    %c0_i32_0 = arith.constant 0 : i32
    %c0_i32_1 = arith.constant 0 : i32
    return %c0_i32, %c0_i32_0 : i32, i32
  }
  func.func @transform_4(%arg0: i32) -> (i32, i32) {
    %c0_i32 = arith.constant 0 : i32
    %c0_i32_0 = arith.constant 0 : i32
    %c0_i32_1 = arith.constant 0 : i32
    return %c0_i32, %c0_i32_0 : i32, i32
  }
  func.func @transform_5(%arg0: i32) -> (i32, i32) {
    %c0_i32 = arith.constant 0 : i32
    %c0_i32_0 = arith.constant 0 : i32
    %c0_i32_1 = arith.constant 0 : i32
    return %c0_i32, %c0_i32_0 : i32, i32
  }
  func.func @transform_6(%arg0: i32) -> (i32, i32) {
    %c0_i32 = arith.constant 0 : i32
    %c0_i32_0 = arith.constant 0 : i32
    %c0_i32_1 = arith.constant 0 : i32
    return %c0_i32, %c0_i32_0 : i32, i32
  }
  func.func @transform_7(%arg0: i32) -> (i32, i32) {
    %c0_i32 = arith.constant 0 : i32
    %c0_i32_0 = arith.constant 0 : i32
    %c0_i32_1 = arith.constant 0 : i32
    return %c0_i32, %c0_i32_0 : i32, i32
  }
  func.func @transform_8(%arg0: i32) -> i32 {
    %c0_i32 = arith.constant 0 : i32
    %c0_i32_0 = arith.constant 0 : i32
    return %c0_i32 : i32
  }
  func.func @transform_9(%arg0: i32) -> (i32, i32) {
    %c0_i32 = arith.constant 0 : i32
    %c0_i32_0 = arith.constant 0 : i32
    return %arg0, %c0_i32 : i32, i32
  }
  func.func @transform_10(%arg0: i32) -> (i32, i32) {
    %c0_i32 = arith.constant 0 : i32
    %c0_i32_0 = arith.constant 0 : i32
    return %arg0, %c0_i32 : i32, i32
  }
}

</mosaic_0001>

<bundles_post_ra>
// kernel: tpu_custom_call.1
= control target key start
LH: loop header
LB: loop body
LE: loop exit
PB: predicated region body
PF: predicated region fallthrough
CT: control target
= control target key end

     0   :  { %16 = vsyncpa [#allocation4], 0  ;;  %s4690_s0 = inlined_call_operand.vmem [shape: f32[2,512,196], index: 0, kind: input, shape index: {}]   ;;  %s4691_s1 = inlined_call_operand.vmem [shape: f32[2,16,512], index: 1, kind: input, shape index: {}]   ;;  %s4692_s2 = inlined_call_operand.vmem [shape: f32[128,512], index: 2, kind: input, shape index: {}]   ;;  %s4693_s3 = inlined_call_operand.vmem [shape: f32[1,128], index: 3, kind: input, shape index: {}]   ;;  %s4694_s4 = inlined_call_operand.vmem [shape: f32[512,128], index: 4, kind: input, shape index: {}]   ;;  %s4695_s5 = inlined_call_operand.vmem [shape: f32[1,128], index: 5, kind: input, shape index: {}]   ;;  %s4696_s6 = inlined_call_operand.vmem [shape: f32[128,128], index: 6, kind: input, shape index: {}]   ;;  %s4697_s7 = inlined_call_operand.vmem [shape: f32[1,128], index: 7, kind: input, shape index: {}]   ;;  %s4698_s8 = inlined_call_operand.vmem [shape: f32[2], index: 8, kind: input, shape index: {}]   ;;  %s4699_s9 = inlined_call_operand.vmem [shape: f32[2,1], index: 9, kind: output, shape index: {0}]   ;;  %s4700_s10 = inlined_call_operand.hbm [shape: f32[2,196], index: 10, kind: output, shape index: {1}]  }
   0x1   :  { %17 = vsyncpa [#allocation3], 0  ;;  %s40_s15 = sshll.u32 %s4698_s8, 4  ;;  %s41_s15 = int_to_ptr.vmem [resolvable:$true] %s40_s15 }
   0x2   :  { %s2530_s16 = scalar_lea.vmem %s41_s15, 16  ;;  %p2535_p1 = scmp.lt.s32.totalorder %s41_s15, %s41_s15 }
   0x3   :  { %p2531_p0 = scmp.ne.s32.totalorder %s41_s15, %s2530_s16  ;;  %p2536_p2 = scmp.lt.s32.totalorder %s2530_s16, %s2530_s16 }
   0x5   :  { %p2537_p3 = por %p2536_p2, %p2535_p1 }
   0x7   :  { %p2538_p4 = pnand %p2537_p3, %p2531_p0 }
   0x9   :  { %2541 = shalt.err (!%p2538_p4)
}
   0xa   :  { %s2568_s17 = smov [#allocation2]  }
   0xb   :  { %43 = dma.vmem_to_smem %s41_s15, 16, %s2568_s17, [#allocation4]  }
   0xc   :  { %2564 = dma.done.wait [#allocation4], 16  }
   0xd   :  { %2565 = vsyncadd [#allocation4], 4294967280 }
   0xe   :  { %47 = sfence }
   0xf   :  { %v136_v0 = vld [vmem:[%s4694_s4 + $0x80] sm:$0xff]  ;;  %v137_v1 = vld [vmem:[%s4694_s4 + $0x88] sm:$0xff]  ;;  %v138_v11 = vld [vmem:[%s4694_s4 + $0x90] sm:$0xff]  ;;  %vm199_vm0 = vcmask 1041409   ;;  %vm2570_vm1 = vmmov 0   ;;  %vm1777_vm2 = vcmask 556032  }
  0x10   :  { %v120_v2 = vld [vmem:[%s4694_s4] sm:$0xff]  ;;  %v2356_v3 = vpack.c.bf16 %v137_v1, %v136_v0  ;;  %v121_v4 = vld [vmem:[%s4694_s4 + $0x8] sm:$0xff]  ;;  %v139_v13 = vld [vmem:[%s4694_s4 + $0x98] sm:$0xff]  ;;  %vm656_vm3 = vcmask 1041408   ;;  %s2229_s12 = sld [smem:[#allocation2 + $0x1]]  ;;  %vm2200_vm4 = vcmask 549888  }
  0x11   :  { %v168_v5 = vld [vmem:[%s4694_s4 + $0x180] sm:$0xff]  ;;  %v169_v6 = vld [vmem:[%s4694_s4 + $0x188] sm:$0xff]  ;;  %v2358_v7 = vpack.c.bf16 %v121_v4, %v120_v2  ;;  %v122_v14 = vld [vmem:[%s4694_s4 + $0x10] sm:$0xff]  ;;  %v2360_v16 = vpack.c.bf16 %v139_v13, %v138_v11  ;;  %vm2183_vm5 = vcmask 1043459   ;;  %vm2190_vm6 = vcmask 551938   ;;  %s2573_s13 = smov [#allocation5]  }
  0x12   :  { %v2388_v8 = vpack.c.bf16 %v169_v6, %v168_v5  ;;  %v152_v9 = vld [vmem:[%s4694_s4 + $0x100] sm:$0xff]  ;;  %v153_v10 = vld [vmem:[%s4694_s4 + $0x108] sm:$0xff]  ;;  %2357 = vmatprep.subr.bf16.mxu0 %v2356_v3  ;;  %v123_v15 = vld [vmem:[%s4694_s4 + $0x18] sm:$0xff]  ;;  %vm2185_vm7 = vcmask 1045509   ;;  %vm2187_vm8 = vcmask 1047559   ;;  %s2215_s14 = sshll.u32 %s2573_s13, 4  ;;  %s2216_s14 = int_to_ptr.vmem [resolvable:$true] %s2215_s14 }
  0x13   :  { %v2390_v12 = vpack.c.bf16 %v153_v10, %v152_v9  ;;  %2359 = vmatpush3.bf16.msra.mxu0 %v2358_v7  ;;  %v2362_v17 = vpack.c.bf16 %v123_v15, %v122_v14  ;;  %v170_v18 = vld [vmem:[%s4694_s4 + $0x190] sm:$0xff]  ;;  %v171_v19 = vld [vmem:[%s4694_s4 + $0x198] sm:$0xff]  ;;  %v140_v23 = vld [vmem:[%s4694_s4 + $0xa0] sm:$0xff]  ;;  %s2542_s15 = scalar_lea.vmem %s2216_s14, 64  ;;  %p2547_p6 = scmp.lt.s32.totalorder %s2216_s14, %s2216_s14 }
  0x14   :  { %2389 = vmatprep.subr.bf16.mxu1 %v2388_v8  ;;  %v154_v20 = vld [vmem:[%s4694_s4 + $0x110] sm:$0xff]  ;;  %v2392_v21 = vpack.c.bf16 %v171_v19, %v170_v18  ;;  %v155_v22 = vld [vmem:[%s4694_s4 + $0x118] sm:$0xff]  ;;  %v141_v24 = vld [vmem:[%s4694_s4 + $0xa8] sm:$0xff]  ;;  %2361 = vmatprep.subr.bf16.mxu0 %v2360_v16  ;;  %p2543_p5 = scmp.ne.s32.totalorder %s2216_s14, %s2542_s15  ;;  %p2548_p7 = scmp.lt.s32.totalorder %s2542_s15, %s2542_s15 }
  0x15   :  { %2391 = vmatpush3.bf16.msra.mxu1 %v2390_v12  ;;  %v2394_v25 = vpack.c.bf16 %v155_v22, %v154_v20  ;;  %v2364_v26 = vpack.c.bf16 %v141_v24, %v140_v23  ;;  %v124_v27 = vld [vmem:[%s4694_s4 + $0x20] sm:$0xff]  ;;  %v125_v28 = vld [vmem:[%s4694_s4 + $0x28] sm:$0xff]  ;;  %v142_v35 = vld [vmem:[%s4694_s4 + $0xb0] sm:$0xff] }
  0x16   :  { %v172_v29 = vld [vmem:[%s4694_s4 + $0x1a0] sm:$0xff]  ;;  %2393 = vmatprep.subr.bf16.mxu1 %v2392_v21  ;;  %v173_v30 = vld [vmem:[%s4694_s4 + $0x1a8] sm:$0xff]  ;;  %v2366_v33 = vpack.c.bf16 %v125_v28, %v124_v27  ;;  %v143_v36 = vld [vmem:[%s4694_s4 + $0xb8] sm:$0xff]  ;;  %p2549_p8 = por %p2548_p7, %p2547_p6 }
  0x17   :  { %v156_v31 = vld [vmem:[%s4694_s4 + $0x120] sm:$0xff]  ;;  %v157_v32 = vld [vmem:[%s4694_s4 + $0x128] sm:$0xff]  ;;  %2363 = vmatpush3.bf16.msra.mxu0 %v2362_v17  ;;  %v2396_v34 = vpack.c.bf16 %v173_v30, %v172_v29  ;;  %v126_v37 = vld [vmem:[%s4694_s4 + $0x30] sm:$0xff]  ;;  %v2368_v39 = vpack.c.bf16 %v143_v36, %v142_v35 }
  0x18   :  { %2365 = vmatprep.subr.bf16.mxu0 %v2364_v26  ;;  %v2398_v38 = vpack.c.bf16 %v157_v32, %v156_v31  ;;  %v127_v40 = vld [vmem:[%s4694_s4 + $0x38] sm:$0xff]  ;;  %v174_v41 = vld [vmem:[%s4694_s4 + $0x1b0] sm:$0xff]  ;;  %v144_v46 = vld [vmem:[%s4694_s4 + $0xc0] sm:$0xff]  ;;  %p2550_p9 = pnand %p2549_p8, %p2543_p5 }
  0x19   :  { %2395 = vmatpush3.bf16.msra.mxu1 %v2394_v25  ;;  %v175_v42 = vld [vmem:[%s4694_s4 + $0x1b8] sm:$0xff]  ;;  %v158_v44 = vld [vmem:[%s4694_s4 + $0x130] sm:$0xff]  ;;  %v145_v47 = vld [vmem:[%s4694_s4 + $0xc8] sm:$0xff]  ;;  %v2370_v48 = vpack.c.bf16 %v127_v40, %v126_v37 }
  0x1a   :  { %2397 = vmatprep.subr.bf16.mxu1 %v2396_v34  ;;  %v2400_v43 = vpack.c.bf16 %v175_v42, %v174_v41  ;;  %v159_v45 = vld [vmem:[%s4694_s4 + $0x138] sm:$0xff]  ;;  %v176_v49 = vld [vmem:[%s4694_s4 + $0x1c0] sm:$0xff]  ;;  %v177_v50 = vld [vmem:[%s4694_s4 + $0x1c8] sm:$0xff]  ;;  %v2372_v52 = vpack.c.bf16 %v145_v47, %v144_v46 }
  0x1b   :  { %2367 = vmatpush3.bf16.msra.mxu0 %v2366_v33  ;;  %v2402_v51 = vpack.c.bf16 %v159_v45, %v158_v44  ;;  %v128_v53 = vld [vmem:[%s4694_s4 + $0x40] sm:$0xff]  ;;  %v129_v54 = vld [vmem:[%s4694_s4 + $0x48] sm:$0xff]  ;;  %v2404_v56 = vpack.c.bf16 %v177_v50, %v176_v49  ;;  %v146_v58 = vld [vmem:[%s4694_s4 + $0xd0] sm:$0xff] }
  0x1c   :  { %2369 = vmatprep.subr.bf16.mxu0 %v2368_v39  ;;  %v160_v55 = vld [vmem:[%s4694_s4 + $0x140] sm:$0xff]  ;;  %v161_v57 = vld [vmem:[%s4694_s4 + $0x148] sm:$0xff]  ;;  %v147_v59 = vld [vmem:[%s4694_s4 + $0xd8] sm:$0xff]  ;;  %v2374_v0 = vpack.c.bf16 %v129_v54, %v128_v53 }
  0x1d   :  { %2399 = vmatpush3.bf16.msra.mxu1 %v2398_v38  ;;  %v130_v60 = vld [vmem:[%s4694_s4 + $0x50] sm:$0xff]  ;;  %v131_v61 = vld [vmem:[%s4694_s4 + $0x58] sm:$0xff]  ;;  %v148_v3 = vld [vmem:[%s4694_s4 + $0xe0] sm:$0xff]  ;;  %v2406_v4 = vpack.c.bf16 %v161_v57, %v160_v55  ;;  %v2376_v5 = vpack.c.bf16 %v147_v59, %v146_v58 }
  0x1e   :  { %2401 = vmatprep.subr.bf16.mxu1 %v2400_v43  ;;  %v178_v62 = vld [vmem:[%s4694_s4 + $0x1d0] sm:$0xff]  ;;  %v179_v63 = vld [vmem:[%s4694_s4 + $0x1d8] sm:$0xff]  ;;  %v149_v6 = vld [vmem:[%s4694_s4 + $0xe8] sm:$0xff]  ;;  %v2378_v18 = vpack.c.bf16 %v131_v61, %v130_v60 }
  0x1f   :  { %2371 = vmatpush3.bf16.msra.mxu0 %v2370_v48  ;;  %v162_v1 = vld [vmem:[%s4694_s4 + $0x150] sm:$0xff]  ;;  %v163_v2 = vld [vmem:[%s4694_s4 + $0x158] sm:$0xff]  ;;  %v180_v7 = vld [vmem:[%s4694_s4 + $0x1e0] sm:$0xff]  ;;  %v2408_v9 = vpack.c.bf16 %v179_v63, %v178_v62  ;;  %v2380_v23 = vpack.c.bf16 %v149_v6, %v148_v3 }
  0x20   :  { %2373 = vmatprep.subr.bf16.mxu0 %v2372_v52  ;;  %v181_v8 = vld [vmem:[%s4694_s4 + $0x1e8] sm:$0xff]  ;;  %v132_v10 = vld [vmem:[%s4694_s4 + $0x60] sm:$0xff]  ;;  %v2807_v14 = vld [vmem:[%s4694_s4 + $0xf0] sm:$0xff]  ;;  %v2410_v22 = vpack.c.bf16 %v163_v2, %v162_v1 }
  0x21   :  { %2403 = vmatpush3.bf16.msra.mxu1 %v2402_v51  ;;  %v133_v11 = vld [vmem:[%s4694_s4 + $0x68] sm:$0xff]  ;;  %v2797_v12 = vld [vmem:[%s4694_s4 + $0x160] sm:$0xff]  ;;  %v2812_v15 = vld [vmem:[%s4694_s4 + $0xf8] sm:$0xff]  ;;  %v2412_v27 = vpack.c.bf16 %v181_v8, %v180_v7 }
  0x22   :  { %2405 = vmatprep.subr.bf16.mxu1 %v2404_v56  ;;  %v2802_v13 = vld [vmem:[%s4694_s4 + $0x168] sm:$0xff]  ;;  %v2817_v16 = vld [vmem:[%s4694_s4 + $0x70] sm:$0xff]  ;;  %v2822_v17 = vld [vmem:[%s4694_s4 + $0x78] sm:$0xff]  ;;  %v2382_v32 = vpack.c.bf16 %v133_v11, %v132_v10  ;;  %v2384_v34 = vpack.c.bf16 %v2812_v15, %v2807_v14 }
  0x23   :  { %2375 = vmatpush3.bf16.msra.mxu0 %v2374_v0  ;;  %v2827_v19 = vld [vmem:[%s4694_s4 + $0x1f0] sm:$0xff]  ;;  %v183_v20 = vld [vmem:[%s4694_s4 + $0x1f8] sm:$0xff]  ;;  %v49_v25 = vld [vmem:[%s4691_s1 + $0x8] sm:$0xff]  ;;  %v2414_v33 = vpack.c.bf16 %v2802_v13, %v2797_v12  ;;  %v2386_v39 = vpack.c.bf16 %v2822_v17, %v2817_v16 }
  0x24   :  { %v2835_v21 = vld [vmem:[%s4694_s4 + $0x170] sm:$0xff]  ;;  %2377 = vmatprep.subr.bf16.mxu0 %v2376_v5  ;;  %v2840_v24 = vld [vmem:[%s4694_s4 + $0x178] sm:$0xff]  ;;  %v53_v26 = vld [vmem:[%s4691_s1 + $0x28] sm:$0xff]  ;;  %v2416_v46 = vpack.c.bf16 %v183_v20, %v2827_v19 }
  0x25   :  { %2407 = vmatpush3.bf16.msra.mxu1 %v2406_v4  ;;  %v57_v28 = vld [vmem:[%s4691_s1 + $0x48] sm:$0xff]  ;;  %v71_v30 = vmax.f32 %v49_v25, %v53_v26  ;;  %v48_v31 = vld [vmem:[%s4691_s1] sm:$0xff]  ;;  %v51_v43 = vld [vmem:[%s4691_s1 + $0x18] sm:$0xff]  ;;  %v2418_v47 = vpack.c.bf16 %v2840_v24, %v2835_v21 }
  0x26   :  { %2409 = vmatprep.subr.bf16.mxu1 %v2408_v9  ;;  %v61_v29 = vld [vmem:[%s4691_s1 + $0x68] sm:$0xff]  ;;  %v52_v36 = vld [vmem:[%s4691_s1 + $0x20] sm:$0xff]  ;;  %v55_v44 = vld [vmem:[%s4691_s1 + $0x38] sm:$0xff] }
  0x27   :  { %v99_v35 = vmax.f32 %v57_v28, %v61_v29  ;;  %v56_v37 = vld [vmem:[%s4691_s1 + $0x40] sm:$0xff]  ;;  %2379 = vmatpush3.bf16.msra.mxu0 %v2378_v18  ;;  %v72_v40 = vrot.slane %v71_v30, 4  ;;  %v64_v41 = vmax.f32 %v48_v31, %v52_v36  ;;  %v59_v45 = vld [vmem:[%s4691_s1 + $0x58] sm:$0xff]  ;;  %v85_v50 = vmax.f32 %v51_v43, %v55_v44  ;;  %v50_v51 = vld [vmem:[%s4691_s1 + $0x10] sm:$0xff] }
  0x28   :  { %v60_v38 = vld [vmem:[%s4691_s1 + $0x60] sm:$0xff]  ;;  %2381 = vmatprep.subr.bf16.mxu0 %v2380_v23  ;;  %v63_v49 = vld [vmem:[%s4691_s1 + $0x78] sm:$0xff]  ;;  %v54_v52 = vld [vmem:[%s4691_s1 + $0x30] sm:$0xff]  ;;  %v2569_v23 = vmov 0.0|0.0  }
  0x29   :  { %v92_v42 = vmax.f32 %v56_v37, %v60_v38  ;;  %2411 = vmatpush3.bf16.msra.mxu1 %v2410_v22  ;;  %v100_v48 = vrot.slane %v99_v35, 4  ;;  %v73_v53 = vmax.f32 %v71_v30, %v72_v40  ;;  %v65_v54 = vrot.slane %v64_v41, 4  ;;  %v58_v57 = vld [vmem:[%s4691_s1 + $0x50] sm:$0xff]  ;;  %v349_v24 = vld [vmem:[%s4696_s6] sm:$0xff]  ;;  %v350_v25 = vld [vmem:[%s4696_s6 + $0x8] sm:$0xff] }
  0x2a   :  { %2413 = vmatprep.subr.bf16.mxu1 %v2412_v27  ;;  %v113_v56 = vmax.f32 %v59_v45, %v63_v49  ;;  %v62_v58 = vld [vmem:[%s4691_s1 + $0x70] sm:$0xff]  ;;  %v86_v60 = vrot.slane %v85_v50, 4  ;;  %v78_v61 = vmax.f32 %v50_v51, %v54_v52  ;;  %v2421_v37 = vpack.c.bf16 %v350_v25, %v349_v24  ;;  %v352_v43 = vld [vmem:[%s4696_s6 + $0x18] sm:$0xff]  ;;  %v353_v51 = vld [vmem:[%s4696_s6 + $0x20] sm:$0xff] }
  0x2b   :  { %v93_v55 = vrot.slane %v92_v42, 4  ;;  %v101_v59 = vmax.f32 %v99_v35, %v100_v48  ;;  %v106_v62 = vmax.f32 %v58_v57, %v62_v58  ;;  %2383 = vmatpush3.bf16.msra.mxu0 %v2382_v32  ;;  %v74_v63 = vrot.slane %v73_v53, 2  ;;  %v354_v52 = vld [vmem:[%s4696_s6 + $0x28] sm:$0xff]  ;;  %v357_v57 = vld [vmem:[%s4696_s6 + $0x40] sm:$0xff]  ;;  %vm2191_vm9 = vmor %vm2190_vm6, %vm656_vm3 }
  0x2c   :  { %v66_v0 = vmax.f32 %v64_v41, %v65_v54  ;;  %v114_v2 = vrot.slane %v113_v56, 4  ;;  %2385 = vmatprep.subr.bf16.mxu0 %v2384_v34  ;;  %v87_v4 = vmax.f32 %v85_v50, %v86_v60  ;;  %v79_v5 = vrot.slane %v78_v61, 4  ;;  %v355_v54 = vld [vmem:[%s4696_s6 + $0x30] sm:$0xff]  ;;  %v358_v58 = vld [vmem:[%s4696_s6 + $0x48] sm:$0xff]  ;;  %v458_v24 = vld [vmem:[%s4692_s2 + $0x80] sm:$0xff] }
  0x2d   :  { %v94_v1 = vmax.f32 %v92_v42, %v93_v55  ;;  %2415 = vmatpush3.bf16.msra.mxu1 %v2414_v33  ;;  %v102_v3 = vrot.slane %v101_v59, 2  ;;  %v107_v6 = vrot.slane %v106_v62, 4  ;;  %v75_v7 = vmax.f32 %v73_v53, %v74_v63  ;;  %v351_v42 = vld [vmem:[%s4696_s6 + $0x10] sm:$0xff]  ;;  %v356_v55 = vld [vmem:[%s4696_s6 + $0x38] sm:$0xff]  ;;  %v361_v63 = vld [vmem:[%s4696_s6 + $0x60] sm:$0xff] }
  0x2e   :  { %2417 = vmatprep.subr.bf16.mxu1 %v2416_v46  ;;  %v67_v8 = vrot.slane %v66_v0, 2  ;;  %v115_v10 = vmax.f32 %v113_v56, %v114_v2  ;;  %v88_v12 = vrot.slane %v87_v4, 2  ;;  %v80_v13 = vmax.f32 %v78_v61, %v79_v5  ;;  %v359_v60 = vld [vmem:[%s4696_s6 + $0x50] sm:$0xff]  ;;  %v360_v61 = vld [vmem:[%s4696_s6 + $0x58] sm:$0xff]  ;;  %v462_v25 = vld [vmem:[%s4692_s2 + $0xa0] sm:$0xff] }
  0x2f   :  { %v95_v9 = vrot.slane %v94_v1, 2  ;;  %v103_v11 = vmax.f32 %v101_v59, %v102_v3  ;;  %v108_v14 = vmax.f32 %v106_v62, %v107_v6  ;;  %2387 = vmatpush3.bf16.msra.mxu0 %v2386_v39  ;;  %v76_v15 = vrot.slane %v75_v7, 1  ;;  %v363_v2 = vld [vmem:[%s4696_s6 + $0x70] sm:$0xff]  ;;  %v364_v3 = vld [vmem:[%s4696_s6 + $0x78] sm:$0xff]  ;;  %v443_v6 = vld [vmem:[%s4692_s2 + $0x8] sm:$0xff] }
  0x30   :  { %v68_v16 = vmax.f32 %v66_v0, %v67_v8  ;;  %v116_v18 = vrot.slane %v115_v10, 2  ;;  %v89_v20 = vmax.f32 %v87_v4, %v88_v12  ;;  %v81_v21 = vrot.slane %v80_v13, 2  ;;  %2420 = vmatprep.subr.bf16.mxu0 %v2569_v23  ;;  %v362_v0 = vld [vmem:[%s4696_s6 + $0x68] sm:$0xff]  ;;  %v445_v8 = vld [vmem:[%s4692_s2 + $0x18] sm:$0xff]  ;;  %v446_v12 = vld [vmem:[%s4692_s2 + $0x20] sm:$0xff] }
  0x31   :  { %v96_v17 = vmax.f32 %v94_v1, %v95_v9  ;;  %2419 = vmatpush3.bf16.msra.mxu1 %v2418_v47  ;;  %v104_v19 = vrot.slane %v103_v11, 1  ;;  %v109_v22 = vrot.slane %v108_v14, 2  ;;  %v77_v26 = vmax.f32 %v75_v7, %v76_v15  ;;  %v447_v7 = vld [vmem:[%s4692_s2 + $0x28] sm:$0xff] }
  0x32   :  { %v69_v27 = vrot.slane %v68_v16, 1  ;;  %v117_v29 = vmax.f32 %v115_v10, %v116_v18  ;;  %v90_v31 = vrot.slane %v89_v20, 1  ;;  %v82_v32 = vmax.f32 %v80_v13, %v81_v21  ;;  %v449_v10 = vld [vmem:[%s4692_s2 + $0x38] sm:$0xff]  ;;  %v451_v15 = vld [vmem:[%s4692_s2 + $0x48] sm:$0xff]  ;;  %v450_v18 = vld [vmem:[%s4692_s2 + $0x40] sm:$0xff] }
  0x33   :  { %v97_v28 = vrot.slane %v96_v17, 1  ;;  %v105_v30 = vmax.f32 %v103_v11, %v104_v19  ;;  %v110_v33 = vmax.f32 %v108_v14, %v109_v22  ;;  %v2424_v49 = vpack.c.bf16 %v352_v43, %v351_v42  ;;  %v442_v11 = vld [vmem:[%s4692_s2] sm:$0xff]  ;;  %v459_v21 = vld [vmem:[%s4692_s2 + $0x88] sm:$0xff] }
  0x34   :  { %v70_v34 = vmax.f32 %v68_v16, %v69_v27  ;;  %v118_v36 = vrot.slane %v117_v29, 1  ;;  %v91_v39 = vmax.f32 %v89_v20, %v90_v31  ;;  %v83_v40 = vrot.slane %v82_v32, 1  ;;  %v455_v16 = vld [vmem:[%s4692_s2 + $0x68] sm:$0xff]  ;;  %v454_v19 = vld [vmem:[%s4692_s2 + $0x60] sm:$0xff] }
  0x35   :  { %v98_v35 = vmax.f32 %v96_v17, %v97_v28  ;;  %v201_v38 = vsel %vm199_vm0, %v105_v30, %v77_v26  ;;  %v111_v41 = vrot.slane %v110_v33, 1  ;;  %v2427_v53 = vpack.c.bf16 %v354_v52, %v353_v51  ;;  %v463_v22 = vld [vmem:[%s4692_s2 + $0xa8] sm:$0xff]  ;;  %v466_v30 = vld [vmem:[%s4692_s2 + $0xc0] sm:$0xff] }
  0x36   :  { %272 = vmatprep.mubr.f32.mxu0 %v201_v38  ;;  %v119_v45 = vmax.f32 %v117_v29, %v118_v36  ;;  %v84_v46 = vmax.f32 %v82_v32, %v83_v40  ;;  %v2430_v56 = vpack.c.bf16 %v356_v55, %v355_v54  ;;  %v2433_v59 = vpack.c.bf16 %v358_v58, %v357_v57  ;;  %v467_v27 = vld [vmem:[%s4692_s2 + $0xc8] sm:$0xff]  ;;  %v470_v31 = vld [vmem:[%s4692_s2 + $0xe0] sm:$0xff] }
  0x37   :  { %v200_v44 = vsel %vm199_vm0, %v98_v35, %v70_v34  ;;  %v112_v47 = vmax.f32 %v110_v33, %v111_v41  ;;  %v2436_v62 = vpack.c.bf16 %v360_v61, %v359_v60  ;;  %v2439_v1 = vpack.c.bf16 %v362_v0, %v361_v63  ;;  %v471_v28 = vld [vmem:[%s4692_s2 + $0xe8] sm:$0xff]  ;;  %v474_v36 = vld [vmem:[%s4692_s2 + $0x100] sm:$0xff]  ;;  %v448_v63 = vld [vmem:[%s4692_s2 + $0x30] sm:$0xff] }
  0x38   :  { %273 = vmatmul.mubr.f32.vlgmr.msra.gmra.mrb[0].mxu0 %v200_v44  ;;  %v203_v48 = vsel %vm199_vm0, %v119_v45, %v91_v39  ;;  %v2442_v4 = vpack.c.bf16 %v364_v3, %v363_v2  ;;  %v2571_v5 = vmov 0.0   ;;  %v2444_v9 = vpack.c.bf16 %v447_v7, %v443_v6  ;;  %v475_v33 = vld [vmem:[%s4692_s2 + $0x108] sm:$0xff]  ;;  %v482_v42 = vld [vmem:[%s4692_s2 + $0x140] sm:$0xff]  ;;  %v453_v0 = vld [vmem:[%s4692_s2 + $0x58] sm:$0xff] }
  0x39   :  { %2422 = vmatpush3.bf16.msra.mxu0 %v2421_v37  ;;  %342 = vmatprep.mubr.f32.mxu1 %v203_v48  ;;  %v202_v50 = vsel %vm199_vm0, %v112_v47, %v84_v46  ;;  %v2476_v13 = vpack.c.bf16 %v449_v10, %v445_v8  ;;  %v2446_v14 = vpack.c.bf16 %v446_v12, %v442_v11  ;;  %v479_v34 = vld [vmem:[%s4692_s2 + $0x128] sm:$0xff]  ;;  %v478_v37 = vld [vmem:[%s4692_s2 + $0x120] sm:$0xff]  ;;  %v452_v7 = vld [vmem:[%s4692_s2 + $0x50] sm:$0xff] }
  0x3a   :  { %2423 = vmatprep.subr.bf16.mxu0 %v2569_v23  ;;  %343 = vmatmul.mubr.f32.vlgmr.msra.gmra.mrb[0].mxu1 %v202_v50  ;;  %v2448_v17 = vpack.c.bf16 %v455_v16, %v451_v15  ;;  %v2450_v20 = vpack.c.bf16 %v454_v19, %v450_v18  ;;  %v2454_v26 = vpack.c.bf16 %v462_v25, %v458_v24  ;;  %v483_v39 = vld [vmem:[%s4692_s2 + $0x148] sm:$0xff]  ;;  %v486_v43 = vld [vmem:[%s4692_s2 + $0x160] sm:$0xff]  ;;  %v456_v8 = vld [vmem:[%s4692_s2 + $0x70] sm:$0xff] }
  0x3b   :  { %2353 = vmatprep.mubr.msk.f32.mxu0 %vm2570_vm1, %v2571_v5  ;;  %570 = vmatprep.mubr.f32.mxu1 %v2571_v5  ;;  %v2456_v29 = vpack.c.bf16 %v471_v28, %v467_v27  ;;  %v2458_v32 = vpack.c.bf16 %v470_v31, %v466_v30  ;;  %v2460_v35 = vpack.c.bf16 %v479_v34, %v475_v33  ;;  %v487_v40 = vld [vmem:[%s4692_s2 + $0x168] sm:$0xff]  ;;  %v490_v48 = vld [vmem:[%s4692_s2 + $0x180] sm:$0xff]  ;;  %v465_v10 = vld [vmem:[%s4692_s2 + $0xb8] sm:$0xff] }
  0x3c   :  { %2445 = vmatprep.subr.bf16.mxu1 %v2444_v9  ;;  %v2462_v38 = vpack.c.bf16 %v478_v37, %v474_v36  ;;  %v2464_v41 = vpack.c.bf16 %v487_v40, %v483_v39  ;;  %v2466_v44 = vpack.c.bf16 %v486_v43, %v482_v42  ;;  %v491_v45 = vld [vmem:[%s4692_s2 + $0x188] sm:$0xff]  ;;  %v2226_v55 = vld [vmem:[%s4695_s5] ss:$0 sm:$0xff]  ;;  %v461_v9 = vld [vmem:[%s4692_s2 + $0x98] sm:$0xff]  ;;  %v2482_v11 = vpack.c.bf16 %v456_v8, %v452_v7 }
  0x3d   :  { %2425 = vmatpush3.bf16.msra.mxu0 %v2424_v49  ;;  %2447 = vmatpush1.bf16.msra.mxu1 %v2446_v14  ;;  %v495_v46 = vld [vmem:[%s4692_s2 + $0x1a8] sm:$0xff]  ;;  %v494_v49 = vld [vmem:[%s4692_s2 + $0x1a0] sm:$0xff]  ;;  %v2484_v12 = vpack.c.bf16 %v465_v10, %v461_v9  ;;  %v464_v14 = vld [vmem:[%s4692_s2 + $0xb0] sm:$0xff] }
  0x3e   :  { %2426 = vmatprep.subr.bf16.mxu0 %v2569_v23  ;;  %2449 = vmatprep.subr.bf16.mxu1 %v2448_v17  ;;  %v2468_v47 = vpack.c.bf16 %v495_v46, %v491_v45  ;;  %v2470_v50 = vpack.c.bf16 %v494_v49, %v490_v48  ;;  %v499_v51 = vld [vmem:[%s4692_s2 + $0x1c8] sm:$0xff]  ;;  %v469_v15 = vld [vmem:[%s4692_s2 + $0xd8] sm:$0xff]  ;;  %v468_v18 = vld [vmem:[%s4692_s2 + $0xd0] sm:$0xff] }
  0x3f   :  { %v503_v52 = vld [vmem:[%s4692_s2 + $0x1e8] sm:$0xff]  ;;  %v473_v16 = vld [vmem:[%s4692_s2 + $0xf8] sm:$0xff]  ;;  %v472_v19 = vld [vmem:[%s4692_s2 + $0xf0] sm:$0xff] }
  0x40   :  { %v2488_v17 = vpack.c.bf16 %v473_v16, %v469_v15  ;;  %v476_v24 = vld [vmem:[%s4692_s2 + $0x110] sm:$0xff]  ;;  %v489_v27 = vld [vmem:[%s4692_s2 + $0x178] sm:$0xff]  ;;  %v498_v42 = vld [vmem:[%s4692_s2 + $0x1c0] sm:$0xff] }
  0x41   :  { %2428 = vmatpush3.bf16.msra.mxu0 %v2427_v53  ;;  %2451 = vmatpush1.bf16.msra.mxu1 %v2450_v20  ;;  %v2472_v53 = vpack.c.bf16 %v503_v52, %v499_v51  ;;  %v477_v20 = vld [vmem:[%s4692_s2 + $0x118] sm:$0xff]  ;;  %v480_v25 = vld [vmem:[%s4692_s2 + $0x130] sm:$0xff]  ;;  %v502_v43 = vld [vmem:[%s4692_s2 + $0x1e0] sm:$0xff]  ;;  %v660_v52 = vlaneseq }
  0x42   :  { %2429 = vmatprep.subr.bf16.mxu0 %v2569_v23  ;;  %v2494_v28 = vpack.c.bf16 %v480_v25, %v476_v24  ;;  %v484_v30 = vld [vmem:[%s4692_s2 + $0x150] sm:$0xff]  ;;  %v497_v33 = vld [vmem:[%s4692_s2 + $0x1b8] sm:$0xff]  ;;  %v2474_v45 = vpack.c.bf16 %v502_v43, %v498_v42  ;;  %v2227_v48 = vld [vmem:[%s4697_s7] ss:$0 sm:$0xff] }
  0x43   :  { %v488_v31 = vld [vmem:[%s4692_s2 + $0x170] sm:$0xff]  ;;  %v505_v39 = vld [vmem:[%s4692_s2 + $0x1f8] sm:$0xff] }
  0x44   :  { %v2498_v34 = vpack.c.bf16 %v488_v31, %v484_v30  ;;  %v492_v36 = vld [vmem:[%s4692_s2 + $0x190] sm:$0xff] }
  0x45   :  { %2431 = vmatpush3.bf16.msra.mxu0 %v2430_v56  ;;  %v496_v37 = vld [vmem:[%s4692_s2 + $0x1b0] sm:$0xff] }
  0x46   :  { %2432 = vmatprep.subr.bf16.mxu0 %v2569_v23  ;;  %v2502_v40 = vpack.c.bf16 %v496_v37, %v492_v36  ;;  %v504_v46 = vld [vmem:[%s4692_s2 + $0x1f0] sm:$0xff] }
  0x49   :  { %2434 = vmatpush3.bf16.msra.mxu0 %v2433_v59 }
  0x4a   :  { %2435 = vmatprep.subr.bf16.mxu0 %v2569_v23 }
  0x4d   :  { %2437 = vmatpush3.bf16.msra.mxu0 %v2436_v62  ;;  %v444_v62 = vld [vmem:[%s4692_s2 + $0x10] sm:$0xff] }
  0x4e   :  { %2438 = vmatprep.subr.bf16.mxu0 %v2569_v23  ;;  %v2478_v3 = vpack.c.bf16 %v448_v63, %v444_v62 }
  0x51   :  { %2440 = vmatpush3.bf16.msra.mxu0 %v2439_v1  ;;  %v457_v1 = vld [vmem:[%s4692_s2 + $0x78] sm:$0xff] }
  0x52   :  { %2441 = vmatprep.subr.bf16.mxu0 %v2569_v23  ;;  %v2452_v23 = vpack.c.bf16 %v463_v22, %v459_v21  ;;  %v2480_v6 = vpack.c.bf16 %v457_v1, %v453_v0  ;;  %v481_v21 = vld [vmem:[%s4692_s2 + $0x138] sm:$0xff]  ;;  %v2490_v22 = vpack.c.bf16 %v472_v19, %v468_v18 }
  0x54   :  { %2453 = vmatprep.subr.bf16.mxu1 %v2452_v23  ;;  %v2492_v23 = vpack.c.bf16 %v481_v21, %v477_v20 }
  0x55   :  { %2443 = vmatpush3.bf16.msra.mxu0 %v2442_v4  ;;  %2455 = vmatpush1.bf16.msra.mxu1 %v2454_v26  ;;  %v485_v26 = vld [vmem:[%s4692_s2 + $0x158] sm:$0xff] }
  0x56   :  { %2477 = vmatprep.subr.bf16.mxu0 %v2476_v13  ;;  %2457 = vmatprep.subr.bf16.mxu1 %v2456_v29  ;;  %v460_v13 = vld [vmem:[%s4692_s2 + $0x90] sm:$0xff]  ;;  %v2496_v29 = vpack.c.bf16 %v489_v27, %v485_v26 }
  0x59   :  { %2459 = vmatpush1.bf16.msra.mxu1 %v2458_v32  ;;  %v493_v32 = vld [vmem:[%s4692_s2 + $0x198] sm:$0xff] }
  0x5a   :  { %2461 = vmatprep.subr.bf16.mxu1 %v2460_v35  ;;  %v2500_v35 = vpack.c.bf16 %v497_v33, %v493_v32 }
  0x5d   :  { %2463 = vmatpush1.bf16.msra.mxu1 %v2462_v38  ;;  %v501_v38 = vld [vmem:[%s4692_s2 + $0x1d8] sm:$0xff] }
  0x5e   :  { %2465 = vmatprep.subr.bf16.mxu1 %v2464_v41  ;;  %v2504_v41 = vpack.c.bf16 %v505_v39, %v501_v38 }
  0x61   :  { %2467 = vmatpush1.bf16.msra.mxu1 %v2466_v44  ;;  %v500_v44 = vld [vmem:[%s4692_s2 + $0x1d0] sm:$0xff] }
  0x62   :  { %2469 = vmatprep.subr.bf16.mxu1 %v2468_v47  ;;  %v2506_v47 = vpack.c.bf16 %v504_v46, %v500_v44 }
  0x65   :  { %2471 = vmatpush1.bf16.msra.mxu1 %v2470_v50 }
  0x66   :  { %2473 = vmatprep.subr.bf16.mxu1 %v2472_v53  ;;  %v3156_v53 = vshrl.u32 %v660_v52, 7 }
  0x68   :  { %4719 = vst [vmem:[#allocation8_spill] sm:$0xff] %v3156_v53 }
  0x69   :  { %2475 = vmatpush1.bf16.msra.mxu1 %v2474_v45 }
 0x10b   :  { %v2266_v54 = vpop.f32.mrb[0].mxu0 }
 0x10c   :  { %v2267_v56 = vpop.f32.mrb[1].mxu0 }
 0x10d   :  { %v2268_v57 = vadd.f32 %v2267_v56, %v2266_v54  ;;  %v2301_v58 = vpop.f32.mrb[0].mxu1  ;;  %v662_v54 = vsub.s32 0, %v3156_v53 }
 0x10e   :  { %v2302_v60 = vpop.f32.mrb[1].mxu1 }
 0x10f   :  { %v275_v59 = vadd.f32 %v2268_v57, %v2226_v55  ;;  %v2303_v61 = vadd.f32 %v2302_v60, %v2301_v58  ;;  %v930_v55 = vsub.s32 1, %v3156_v53  ;;  %v1324_v53 = vld [vmem:[%s4690_s0 + $0x400] sm:$0xff] }
 0x111   :  { %v345_v2 = vadd.f32 %v2303_v61, %v275_v59 }
 0x113   :  { %v348_v4 = vmax.f32 %v345_v2, 0.0 }
 0x115   :  { %2354 = vmatmul.mubr.f32.vlgmr.msra.gmra.mrb[2].mxu0 %v348_v4 }
 0x116   :  { %2479 = vmatpush1.bf16.msra.mxu0 %v2478_v3  ;;  %641 = vmatprep.mubr.f32.mxu0 %v2571_v5  ;;  %v2486_v5 = vpack.c.bf16 %v464_v14, %v460_v13 }
 0x117   :  { %2481 = vmatprep.subr.bf16.mxu0 %v2480_v6 }
 0x11a   :  { %2483 = vmatpush1.bf16.msra.mxu0 %v2482_v11 }
 0x11b   :  { %2485 = vmatprep.subr.bf16.mxu0 %v2484_v12 }
 0x11e   :  { %2487 = vmatpush1.bf16.msra.mxu0 %v2486_v5 }
 0x11f   :  { %2489 = vmatprep.subr.bf16.mxu0 %v2488_v17 }
 0x122   :  { %2491 = vmatpush1.bf16.msra.mxu0 %v2490_v22 }
 0x123   :  { %2493 = vmatprep.subr.bf16.mxu0 %v2492_v23 }
 0x126   :  { %2495 = vmatpush1.bf16.msra.mxu0 %v2494_v28 }
 0x127   :  { %2497 = vmatprep.subr.bf16.mxu0 %v2496_v29 }
 0x12a   :  { %2499 = vmatpush1.bf16.msra.mxu0 %v2498_v34 }
 0x12b   :  { %2501 = vmatprep.subr.bf16.mxu0 %v2500_v35 }
 0x12e   :  { %2503 = vmatpush1.bf16.msra.mxu0 %v2502_v40 }
 0x12f   :  { %2505 = vmatprep.subr.bf16.mxu0 %v2504_v41 }
 0x132   :  { %2507 = vmatpush1.bf16.msra.mxu0 %v2506_v47 }
 0x1e8   :  { %v438_v49 = vpop.f32.mrb[2].mxu0 }
 0x1e9   :  { %v3152_v50 = vadd.f32 %v2227_v48, %v438_v49  ;;  %v2355_v51 = vpop.f32.mrb[3].mxu0 }
 0x1eb   :  { %571 = vmatmul.mubr.f32.vlgmr.msra.gmra.mrb[2].mxu1 %v3152_v50  ;;  %642 = vmatmul.mubr.f32.vlgmr.msra.gmra.mrb[4].mxu0 %v3152_v50 }
 0x2be   :  { %v572_v56 = vpop.f32.mrb[2].mxu1  ;;  %v643_v57 = vpop.f32.mrb[4].mxu0 }
 0x2bf   :  { %v663_v58 = vrot.slane %v572_v56, %v662_v54  ;;  %v931_v59 = vrot.slane %v572_v56, %v930_v55  ;;  %v3160_v60 = vrot.slane %v643_v57, %v662_v54  ;;  %v3162_v61 = vrot.slane %v643_v57, %v930_v55  ;;  %v574_v62 = vpop.f32.mrb[3].mxu1  ;;  %v645_v63 = vpop.f32.mrb[5].mxu0  ;;  %v1327_v56 = vld [vmem:[%s4690_s0 + $0x418] sm:$0xff] }
 0x2c0   :  { %v3164_v0 = vrot.slane %v574_v62, %v662_v54  ;;  %v3166_v1 = vrot.slane %v574_v62, %v930_v55  ;;  %v3168_v2 = vrot.slane %v645_v63, %v662_v54  ;;  %v3170_v3 = vrot.slane %v645_v63, %v930_v55  ;;  %v1199_v57 = vld [vmem:[%s4690_s0 + $0x18] sm:$0xff]  ;;  %v1198_v62 = vld [vmem:[%s4690_s0 + $0x10] sm:$0xff]  ;;  %v1329_v63 = vld [vmem:[%s4690_s0 + $0x428] sm:$0xff] }
 0x2c1   :  { %933 = vbcast.lane.b32.xlu0 %v931_v59, 256  ;;  %665 = vbcast.lane.b32.xlu1 %v663_v58, 256 }
 0x2c5   :  { %937 = vbcast.lane.b32.xlu0 %v931_v59, 264  ;;  %669 = vbcast.lane.b32.xlu1 %v663_v58, 264 }
 0x2c9   :  { %941 = vbcast.lane.b32.xlu0 %v931_v59, 272  ;;  %673 = vbcast.lane.b32.xlu1 %v663_v58, 272 }
 0x2cd   :  { %945 = vbcast.lane.b32.xlu0 %v931_v59, 280  ;;  %677 = vbcast.lane.b32.xlu1 %v663_v58, 280 }
 0x2d1   :  { %949 = vbcast.lane.b32.xlu0 %v931_v59, 288  ;;  %681 = vbcast.lane.b32.xlu1 %v663_v58, 288 }
 0x2d5   :  { %953 = vbcast.lane.b32.xlu0 %v931_v59, 296  ;;  %685 = vbcast.lane.b32.xlu1 %v663_v58, 296 }
 0x2d9   :  { %957 = vbcast.lane.b32.xlu0 %v931_v59, 304  ;;  %689 = vbcast.lane.b32.xlu1 %v663_v58, 304 }
 0x2dd   :  { %961 = vbcast.lane.b32.xlu0 %v931_v59, 312  ;;  %693 = vbcast.lane.b32.xlu1 %v663_v58, 312 }
 0x2e1   :  { %965 = vbcast.lane.b32.xlu0 %v931_v59, 320  ;;  %697 = vbcast.lane.b32.xlu1 %v663_v58, 320 }
 0x2e5   :  { %969 = vbcast.lane.b32.xlu0 %v931_v59, 328  ;;  %701 = vbcast.lane.b32.xlu1 %v663_v58, 328 }
 0x2e9   :  { %973 = vbcast.lane.b32.xlu0 %v931_v59, 336  ;;  %705 = vbcast.lane.b32.xlu1 %v663_v58, 336 }
 0x2ed   :  { %977 = vbcast.lane.b32.xlu0 %v931_v59, 344  ;;  %709 = vbcast.lane.b32.xlu1 %v663_v58, 344 }
 0x2f1   :  { %981 = vbcast.lane.b32.xlu0 %v931_v59, 352  ;;  %713 = vbcast.lane.b32.xlu1 %v663_v58, 352 }
 0x2f5   :  { %985 = vbcast.lane.b32.xlu0 %v931_v59, 360  ;;  %717 = vbcast.lane.b32.xlu1 %v663_v58, 360 }
 0x2f9   :  { %989 = vbcast.lane.b32.xlu0 %v931_v59, 368  ;;  %721 = vbcast.lane.b32.xlu1 %v663_v58, 368 }
 0x2fd   :  { %993 = vbcast.lane.b32.xlu0 %v931_v59, 376  ;;  %725 = vbcast.lane.b32.xlu1 %v663_v58, 376  ;;  %v1325_v58 = vld [vmem:[%s4690_s0 + $0x408] sm:$0xff] }
 0x2fe   :  { %v1197_v59 = vld [vmem:[%s4690_s0 + $0x8] sm:$0xff] }
 0x301   :  { %1067 = vbcast.lane.b32.xlu0 %v3162_v61, 256  ;;  %799 = vbcast.lane.b32.xlu1 %v3160_v60, 256 }
 0x305   :  { %1071 = vbcast.lane.b32.xlu0 %v3162_v61, 264  ;;  %803 = vbcast.lane.b32.xlu1 %v3160_v60, 264 }
 0x309   :  { %1075 = vbcast.lane.b32.xlu0 %v3162_v61, 272  ;;  %807 = vbcast.lane.b32.xlu1 %v3160_v60, 272 }
 0x30d   :  { %1079 = vbcast.lane.b32.xlu0 %v3162_v61, 280  ;;  %811 = vbcast.lane.b32.xlu1 %v3160_v60, 280 }
 0x311   :  { %1083 = vbcast.lane.b32.xlu0 %v3162_v61, 288  ;;  %815 = vbcast.lane.b32.xlu1 %v3160_v60, 288 }
 0x315   :  { %1087 = vbcast.lane.b32.xlu0 %v3162_v61, 296  ;;  %819 = vbcast.lane.b32.xlu1 %v3160_v60, 296 }
 0x319   :  { %1091 = vbcast.lane.b32.xlu0 %v3162_v61, 304  ;;  %823 = vbcast.lane.b32.xlu1 %v3160_v60, 304 }
 0x31d   :  { %1095 = vbcast.lane.b32.xlu0 %v3162_v61, 312  ;;  %827 = vbcast.lane.b32.xlu1 %v3160_v60, 312 }
 0x321   :  { %1099 = vbcast.lane.b32.xlu0 %v3162_v61, 320  ;;  %831 = vbcast.lane.b32.xlu1 %v3160_v60, 320 }
 0x325   :  { %1103 = vbcast.lane.b32.xlu0 %v3162_v61, 328  ;;  %835 = vbcast.lane.b32.xlu1 %v3160_v60, 328 }
 0x329   :  { %1107 = vbcast.lane.b32.xlu0 %v3162_v61, 336  ;;  %839 = vbcast.lane.b32.xlu1 %v3160_v60, 336 }
 0x32d   :  { %1111 = vbcast.lane.b32.xlu0 %v3162_v61, 344  ;;  %843 = vbcast.lane.b32.xlu1 %v3160_v60, 344 }
 0x331   :  { %1115 = vbcast.lane.b32.xlu0 %v3162_v61, 352  ;;  %847 = vbcast.lane.b32.xlu1 %v3160_v60, 352 }
 0x333   :  { %v3198_v4 = vpop.permute.xlu0 %933  ;;  %v3200_v6 = vpop.permute.xlu1 %665 }
 0x335   :  { %1119 = vbcast.lane.b32.xlu0 %v3162_v61, 360  ;;  %851 = vbcast.lane.b32.xlu1 %v3160_v60, 360 }
 0x337   :  { %v3204_v7 = vpop.permute.xlu0 %937  ;;  %v3206_v8 = vpop.permute.xlu1 %669 }
 0x339   :  { %1123 = vbcast.lane.b32.xlu0 %v3162_v61, 368  ;;  %855 = vbcast.lane.b32.xlu1 %v3160_v60, 368 }
 0x33b   :  { %v3210_v9 = vpop.permute.xlu0 %941  ;;  %v3212_v10 = vpop.permute.xlu1 %673 }
 0x33d   :  { %1127 = vbcast.lane.b32.xlu0 %v3162_v61, 376  ;;  %859 = vbcast.lane.b32.xlu1 %v3160_v60, 376  ;;  %v1326_v60 = vld [vmem:[%s4690_s0 + $0x410] sm:$0xff]  ;;  %v1583_v61 = vmul.f32 %v1327_v56, %v3204_v7  ;;  %v1196_v56 = vld [vmem:[%s4690_s0] sm:$0xff] }
 0x33f   :  { %v3216_v11 = vpop.permute.xlu0 %945  ;;  %v3218_v12 = vpop.permute.xlu1 %677 }
 0x341   :  { %1000 = vbcast.lane.b32.xlu0 %v3166_v1, 256  ;;  %732 = vbcast.lane.b32.xlu1 %v3164_v0, 256 }
 0x343   :  { %v3222_v13 = vpop.permute.xlu0 %949  ;;  %v3224_v14 = vpop.permute.xlu1 %681 }
 0x345   :  { %1004 = vbcast.lane.b32.xlu0 %v3166_v1, 264  ;;  %736 = vbcast.lane.b32.xlu1 %v3164_v0, 264 }
 0x347   :  { %v3228_v15 = vpop.permute.xlu0 %953  ;;  %v3230_v16 = vpop.permute.xlu1 %685 }
 0x349   :  { %1008 = vbcast.lane.b32.xlu0 %v3166_v1, 272  ;;  %740 = vbcast.lane.b32.xlu1 %v3164_v0, 272 }
 0x34b   :  { %v3234_v5 = vpop.permute.xlu0 %957  ;;  %v3236_v17 = vpop.permute.xlu1 %689 }
 0x34d   :  { %1012 = vbcast.lane.b32.xlu0 %v3166_v1, 280  ;;  %744 = vbcast.lane.b32.xlu1 %v3164_v0, 280 }
 0x34f   :  { %v3240_v18 = vpop.permute.xlu0 %961  ;;  %v3242_v19 = vpop.permute.xlu1 %693 }
 0x351   :  { %1016 = vbcast.lane.b32.xlu0 %v3166_v1, 288  ;;  %748 = vbcast.lane.b32.xlu1 %v3164_v0, 288 }
 0x353   :  { %v3246_v20 = vpop.permute.xlu0 %965  ;;  %v3248_v21 = vpop.permute.xlu1 %697 }
 0x355   :  { %1020 = vbcast.lane.b32.xlu0 %v3166_v1, 296  ;;  %752 = vbcast.lane.b32.xlu1 %v3164_v0, 296 }
 0x357   :  { %v3252_v22 = vpop.permute.xlu0 %969  ;;  %v3254_v23 = vpop.permute.xlu1 %701 }
 0x359   :  { %1024 = vbcast.lane.b32.xlu0 %v3166_v1, 304  ;;  %756 = vbcast.lane.b32.xlu1 %v3164_v0, 304 }
 0x35b   :  { %v3258_v24 = vpop.permute.xlu0 %973  ;;  %v3260_v25 = vpop.permute.xlu1 %705 }
 0x35d   :  { %1028 = vbcast.lane.b32.xlu0 %v3166_v1, 312  ;;  %760 = vbcast.lane.b32.xlu1 %v3164_v0, 312 }
 0x35f   :  { %v3264_v26 = vpop.permute.xlu0 %977  ;;  %v3266_v27 = vpop.permute.xlu1 %709 }
 0x361   :  { %1032 = vbcast.lane.b32.xlu0 %v3166_v1, 320  ;;  %764 = vbcast.lane.b32.xlu1 %v3164_v0, 320 }
 0x363   :  { %v3270_v28 = vpop.permute.xlu0 %981  ;;  %v3272_v29 = vpop.permute.xlu1 %713 }
 0x365   :  { %1036 = vbcast.lane.b32.xlu0 %v3166_v1, 328  ;;  %768 = vbcast.lane.b32.xlu1 %v3164_v0, 328 }
 0x367   :  { %v3276_v30 = vpop.permute.xlu0 %985  ;;  %v3278_v31 = vpop.permute.xlu1 %717 }
 0x369   :  { %1040 = vbcast.lane.b32.xlu0 %v3166_v1, 336  ;;  %772 = vbcast.lane.b32.xlu1 %v3164_v0, 336 }
 0x36b   :  { %v3282_v32 = vpop.permute.xlu0 %989  ;;  %v3284_v33 = vpop.permute.xlu1 %721 }
 0x36d   :  { %1044 = vbcast.lane.b32.xlu0 %v3166_v1, 344  ;;  %776 = vbcast.lane.b32.xlu1 %v3164_v0, 344 }
 0x36f   :  { %v3288_v34 = vpop.permute.xlu0 %993  ;;  %v3290_v35 = vpop.permute.xlu1 %725 }
 0x371   :  { %1048 = vbcast.lane.b32.xlu0 %v3166_v1, 352  ;;  %780 = vbcast.lane.b32.xlu1 %v3164_v0, 352 }
 0x373   :  { %v3294_v36 = vpop.permute.xlu0 %1067  ;;  %v3296_v37 = vpop.permute.xlu1 %799 }
 0x375   :  { %1052 = vbcast.lane.b32.xlu0 %v3166_v1, 360  ;;  %784 = vbcast.lane.b32.xlu1 %v3164_v0, 360 }
 0x377   :  { %v3300_v38 = vpop.permute.xlu0 %1071  ;;  %v3302_v39 = vpop.permute.xlu1 %803 }
 0x379   :  { %1056 = vbcast.lane.b32.xlu0 %v3166_v1, 368  ;;  %788 = vbcast.lane.b32.xlu1 %v3164_v0, 368 }
 0x37b   :  { %v3306_v40 = vpop.permute.xlu0 %1075  ;;  %v3308_v41 = vpop.permute.xlu1 %807 }
 0x37d   :  { %1060 = vbcast.lane.b32.xlu0 %v3166_v1, 376  ;;  %792 = vbcast.lane.b32.xlu1 %v3164_v0, 376 }
 0x37f   :  { %v3312_v42 = vpop.permute.xlu0 %1079  ;;  %v3314_v43 = vpop.permute.xlu1 %811 }
 0x381   :  { %1134 = vbcast.lane.b32.xlu0 %v3170_v3, 256  ;;  %866 = vbcast.lane.b32.xlu1 %v3168_v2, 256 }
 0x383   :  { %v3318_v44 = vpop.permute.xlu0 %1083  ;;  %v3320_v45 = vpop.permute.xlu1 %815 }
 0x384   :  { %4720 = vst [vmem:[#allocation9_spill] sm:$0xff] %v3318_v44  ;;  %4721 = vst [vmem:[#allocation10_spill] sm:$0xff] %v3320_v45 }
 0x385   :  { %1138 = vbcast.lane.b32.xlu0 %v3170_v3, 264  ;;  %870 = vbcast.lane.b32.xlu1 %v3168_v2, 264 }
 0x387   :  { %v3324_v46 = vpop.permute.xlu0 %1087  ;;  %v3326_v47 = vpop.permute.xlu1 %819 }
 0x388   :  { %4722 = vst [vmem:[#allocation11_spill] sm:$0xff] %v3324_v46  ;;  %4723 = vst [vmem:[#allocation12_spill] sm:$0xff] %v3326_v47  ;;  %v1203_v46 = vld [vmem:[%s4690_s0 + $0x38] sm:$0xff] }
 0x389   :  { %1142 = vbcast.lane.b32.xlu0 %v3170_v3, 272  ;;  %874 = vbcast.lane.b32.xlu1 %v3168_v2, 272 }
 0x38b   :  { %v3330_v48 = vpop.permute.xlu0 %1091  ;;  %v3332_v49 = vpop.permute.xlu1 %823 }
 0x38c   :  { %4724 = vst [vmem:[#allocation13_spill] sm:$0xff] %v3330_v48  ;;  %4725 = vst [vmem:[#allocation14_spill] sm:$0xff] %v3332_v49  ;;  %v1200_v49 = vld [vmem:[%s4690_s0 + $0x20] sm:$0xff]  ;;  %v1981_v48 = vsel %vm1777_vm2, %v1583_v61, 0.0 }
 0x38d   :  { %1146 = vbcast.lane.b32.xlu0 %v3170_v3, 280  ;;  %878 = vbcast.lane.b32.xlu1 %v3168_v2, 280 }
 0x38f   :  { %v3336_v51 = vpop.permute.xlu0 %1095  ;;  %v3338_v52 = vpop.permute.xlu1 %827 }
 0x390   :  { %4726 = vst [vmem:[#allocation15_spill] sm:$0xff] %v3336_v51  ;;  %4727 = vst [vmem:[#allocation16_spill] sm:$0xff] %v3338_v52  ;;  %v1581_v52 = vmul.f32 %v1325_v58, %v3198_v4  ;;  %v1328_v51 = vld [vmem:[%s4690_s0 + $0x420] sm:$0xff]  ;;  %v1454_v58 = vmul.f32 %v1198_v62, %v3206_v8 }
 0x391   :  { %1150 = vbcast.lane.b32.xlu0 %v3170_v3, 288  ;;  %882 = vbcast.lane.b32.xlu1 %v3168_v2, 288  ;;  %v1584_v62 = vmul.f32 %v1328_v51, %v3210_v9 }
 0x392   :  { %v1980_v61 = vsel %vm1777_vm2, %v1581_v52, 0.0  ;;  %v1332_v52 = vld [vmem:[%s4690_s0 + $0x440] sm:$0xff] }
 0x393   :  { %v3342_v54 = vpop.permute.xlu0 %1099  ;;  %v3344_v55 = vpop.permute.xlu1 %831 }
 0x394   :  { %4728 = vst [vmem:[#allocation17_spill] sm:$0xff] %v3342_v54  ;;  %4729 = vst [vmem:[#allocation18_spill] sm:$0xff] %v3344_v55  ;;  %v1455_v55 = vmul.f32 %v1199_v57, %v3206_v8  ;;  %v1201_v54 = vld [vmem:[%s4690_s0 + $0x28] sm:$0xff]  ;;  %v1331_v57 = vld [vmem:[%s4690_s0 + $0x438] sm:$0xff] }
 0x395   :  { %1154 = vbcast.lane.b32.xlu0 %v3170_v3, 296  ;;  %886 = vbcast.lane.b32.xlu1 %v3168_v2, 296  ;;  %v1457_v47 = vmul.f32 %v1201_v54, %v3212_v10  ;;  %v1202_v54 = vld [vmem:[%s4690_s0 + $0x30] sm:$0xff] }
 0x396   :  { %v1779_v8 = vsel %vm1777_vm2, %v1455_v55, 0.0  ;;  %v1459_v55 = vmul.f32 %v1203_v46, %v3218_v12  ;;  %v1335_v46 = vld [vmem:[%s4690_s0 + $0x458] sm:$0xff] }
 0x397   :  { %v3370_v0 = vpop.permute.xlu0 %1103  ;;  %v3372_v1 = vpop.permute.xlu1 %835 }
 0x398   :  { %4730 = vst [vmem:[#allocation19_spill] sm:$0xff] %v3370_v0  ;;  %4731 = vst [vmem:[#allocation20_spill] sm:$0xff] %v3372_v1  ;;  %v1453_v0 = vmul.f32 %v1197_v59, %v3200_v6  ;;  %v1582_v1 = vmul.f32 %v1326_v60, %v3204_v7  ;;  %v1585_v7 = vmul.f32 %v1329_v63, %v3210_v9  ;;  %v1333_v9 = vld [vmem:[%s4690_s0 + $0x448] sm:$0xff] }
 0x399   :  { %1158 = vbcast.lane.b32.xlu0 %v3170_v3, 304  ;;  %890 = vbcast.lane.b32.xlu1 %v3168_v2, 304  ;;  %v1580_v59 = vmul.f32 %v1324_v53, %v3198_v4  ;;  %v1452_v60 = vmul.f32 %v1196_v56, %v3200_v6  ;;  %v1456_v53 = vmul.f32 %v1200_v49, %v3212_v10  ;;  %v1330_v4 = vld [vmem:[%s4690_s0 + $0x430] sm:$0xff] }
 0x39a   :  { %v1587_v6 = vmul.f32 %v1331_v57, %v3216_v11  ;;  %v1778_v63 = vsel %vm1777_vm2, %v1453_v0, 0.0  ;;  %v1982_v10 = vadd.f32 %v1981_v48, %v1980_v61  ;;  %v1983_v51 = vsel %vm1777_vm2, %v1585_v7, 0.0  ;;  %v1205_v0 = vld [vmem:[%s4690_s0 + $0x48] sm:$0xff] }
 0x39b   :  { %v3407_v45 = vpop.permute.xlu0 %1107  ;;  %v3409_v44 = vpop.permute.xlu1 %839  ;;  %v1911_v56 = vadd.f32 %v1582_v1, %v1580_v59  ;;  %v1708_v49 = vadd.f32 %v1454_v58, %v1452_v60  ;;  %v1780_v1 = vadd.f32 %v1779_v8, %v1778_v63  ;;  %v1781_v57 = vsel %vm1777_vm2, %v1457_v47, 0.0  ;;  %v1204_v58 = vld [vmem:[%s4690_s0 + $0x40] sm:$0xff] }
 0x39c   :  { %v1586_v59 = vmul.f32 %v1330_v4, %v3216_v11  ;;  %v1458_v48 = vmul.f32 %v1202_v54, %v3218_v12  ;;  %v1985_v47 = vsel %vm1777_vm2, %v1587_v6, 0.0  ;;  %v1589_v11 = vmul.f32 %v1333_v9, %v3222_v13  ;;  %v1207_v12 = vld [vmem:[%s4690_s0 + $0x58] sm:$0xff] }
 0x39d   :  { %1162 = vbcast.lane.b32.xlu0 %v3170_v3, 312  ;;  %894 = vbcast.lane.b32.xlu1 %v3168_v2, 312  ;;  %v1912_v61 = vadd.f32 %v1911_v56, %v1584_v62  ;;  %v1709_v8 = vadd.f32 %v1708_v49, %v1456_v53  ;;  %v1984_v4 = vadd.f32 %v1983_v51, %v1982_v10  ;;  %v1206_v62 = vld [vmem:[%s4690_s0 + $0x50] sm:$0xff]  ;;  %v1337_v53 = vld [vmem:[%s4690_s0 + $0x468] sm:$0xff] }
 0x39e   :  { %v1588_v54 = vmul.f32 %v1332_v52, %v3222_v13  ;;  %v1461_v63 = vmul.f32 %v1205_v0, %v3224_v14  ;;  %v1782_v6 = vadd.f32 %v1781_v57, %v1780_v1  ;;  %v1783_v13 = vsel %vm1777_vm2, %v1459_v55, 0.0  ;;  %v1209_v10 = vld [vmem:[%s4690_s0 + $0x68] sm:$0xff]  ;;  %v1208_v55 = vld [vmem:[%s4690_s0 + $0x60] sm:$0xff] }
 0x39f   :  { %v3445_v7 = vpop.permute.xlu0 %1111  ;;  %v3447_v60 = vpop.permute.xlu1 %843  ;;  %v1460_v56 = vmul.f32 %v1204_v58, %v3224_v14  ;;  %v1591_v9 = vmul.f32 %v1335_v46, %v3228_v15  ;;  %v1913_v49 = vadd.f32 %v1912_v61, %v1586_v59  ;;  %v1986_v51 = vadd.f32 %v1985_v47, %v1984_v4  ;;  %v1339_v46 = vld [vmem:[%s4690_s0 + $0x478] sm:$0xff] }
 0x3a0   :  { %4732 = vst [vmem:[#allocation21_spill] sm:$0xff] %v3445_v7  ;;  %4733 = vst [vmem:[#allocation22_spill] sm:$0xff] %v3447_v60  ;;  %v1334_v7 = vld [vmem:[%s4690_s0 + $0x450] sm:$0xff]  ;;  %v1710_v52 = vadd.f32 %v1709_v8, %v1458_v48  ;;  %v1463_v0 = vmul.f32 %v1207_v12, %v3230_v16  ;;  %v1336_v60 = vld [vmem:[%s4690_s0 + $0x460] sm:$0xff]  ;;  %v1987_v57 = vsel %vm1777_vm2, %v1589_v11, 0.0  ;;  %v1462_v48 = vmul.f32 %v1206_v62, %v3230_v16 }
 0x3a1   :  { %1166 = vbcast.lane.b32.xlu0 %v3170_v3, 320  ;;  %898 = vbcast.lane.b32.xlu1 %v3168_v2, 320  ;;  %v1590_v59 = vmul.f32 %v1334_v7, %v3228_v15  ;;  %v1593_v58 = vmul.f32 %v1337_v53, %v3234_v5  ;;  %v1211_v61 = vld [vmem:[%s4690_s0 + $0x78] sm:$0xff]  ;;  %v1784_v8 = vadd.f32 %v1783_v13, %v1782_v6  ;;  %v1785_v12 = vsel %vm1777_vm2, %v1461_v63, 0.0  ;;  %v1338_v62 = vld [vmem:[%s4690_s0 + $0x470] sm:$0xff] }
 0x3a2   :  { %v1914_v47 = vadd.f32 %v1913_v49, %v1588_v54  ;;  %v1465_v11 = vmul.f32 %v1209_v10, %v3236_v17  ;;  %v1711_v15 = vadd.f32 %v1710_v52, %v1460_v56  ;;  %v1989_v16 = vsel %vm1777_vm2, %v1591_v9, 0.0  ;;  %v1341_v54 = vld [vmem:[%s4690_s0 + $0x488] sm:$0xff]  ;;  %v1210_v13 = vld [vmem:[%s4690_s0 + $0x70] sm:$0xff] }
 0x3a3   :  { %v3480_v14 = vpop.permute.xlu0 %1115  ;;  %v3482_v1 = vpop.permute.xlu1 %847  ;;  %v1592_v7 = vmul.f32 %v1336_v60, %v3234_v5  ;;  %v1464_v4 = vmul.f32 %v1208_v55, %v3236_v17  ;;  %v1988_v63 = vadd.f32 %v1987_v57, %v1986_v51  ;;  %v1787_v53 = vsel %vm1777_vm2, %v1463_v0, 0.0  ;;  %v1213_v51 = vld [vmem:[%s4690_s0 + $0x88] sm:$0xff]  ;;  %v1340_v57 = vld [vmem:[%s4690_s0 + $0x480] sm:$0xff] }
 0x3a4   :  { %v1595_v6 = vmul.f32 %v1339_v46, %v3240_v18  ;;  %v1467_v5 = vmul.f32 %v1211_v61, %v3242_v19  ;;  %v1786_v56 = vadd.f32 %v1785_v12, %v1784_v8  ;;  %v1915_v9 = vadd.f32 %v1914_v47, %v1590_v59  ;;  %v1212_v59 = vld [vmem:[%s4690_s0 + $0x80] sm:$0xff]  ;;  %v1215_v47 = vld [vmem:[%s4690_s0 + $0x98] sm:$0xff] }
 0x3a5   :  { %1170 = vbcast.lane.b32.xlu0 %v3170_v3, 328  ;;  %902 = vbcast.lane.b32.xlu1 %v3168_v2, 328  ;;  %v1712_v10 = vadd.f32 %v1711_v15, %v1462_v48  ;;  %v1991_v49 = vsel %vm1777_vm2, %v1593_v58, 0.0  ;;  %v1990_v52 = vadd.f32 %v1989_v16, %v1988_v63  ;;  %v1789_v0 = vsel %vm1777_vm2, %v1465_v11, 0.0  ;;  %v1343_v48 = vld [vmem:[%s4690_s0 + $0x498] sm:$0xff] }
 0x3a6   :  { %v1594_v55 = vmul.f32 %v1338_v62, %v3240_v18  ;;  %v1597_v46 = vmul.f32 %v1341_v54, %v3246_v20  ;;  %v1788_v58 = vadd.f32 %v1787_v53, %v1786_v56  ;;  %v1916_v18 = vadd.f32 %v1915_v9, %v1592_v7  ;;  %v1345_v62 = vld [vmem:[%s4690_s0 + $0x4a8] sm:$0xff]  ;;  %v1342_v53 = vld [vmem:[%s4690_s0 + $0x490] sm:$0xff] }
 0x3a7   :  { %v3513_v17 = vpop.permute.xlu0 %1119  ;;  %v3515_v60 = vpop.permute.xlu1 %851  ;;  %v1713_v61 = vadd.f32 %v1712_v10, %v1464_v4  ;;  %v1466_v8 = vmul.f32 %v1210_v13, %v3242_v19  ;;  %v1992_v12 = vadd.f32 %v1991_v49, %v1990_v52  ;;  %v1993_v11 = vsel %vm1777_vm2, %v1595_v6, 0.0  ;;  %v1214_v13 = vld [vmem:[%s4690_s0 + $0x90] sm:$0xff] }
 0x3a8   :  { %v1791_v15 = vsel %vm1777_vm2, %v1467_v5, 0.0  ;;  %v1469_v16 = vmul.f32 %v1213_v51, %v3248_v21  ;;  %v1790_v19 = vadd.f32 %v1789_v0, %v1788_v58  ;;  %v1596_v4 = vmul.f32 %v1340_v57, %v3246_v20  ;;  %v1217_v5 = vld [vmem:[%s4690_s0 + $0xa8] sm:$0xff]  ;;  %v1344_v51 = vld [vmem:[%s4690_s0 + $0x4a0] sm:$0xff]  ;;  %v1219_v58 = vld [vmem:[%s4690_s0 + $0xb8] sm:$0xff] }
 0x3a9   :  { %1174 = vbcast.lane.b32.xlu0 %v3170_v3, 336  ;;  %906 = vbcast.lane.b32.xlu1 %v3168_v2, 336  ;;  %v1468_v63 = vmul.f32 %v1212_v59, %v3248_v21  ;;  %v1599_v6 = vmul.f32 %v1343_v48, %v3252_v22  ;;  %v1917_v56 = vadd.f32 %v1916_v18, %v1594_v55  ;;  %v1995_v9 = vsel %vm1777_vm2, %v1597_v46, 0.0  ;;  %v1216_v0 = vld [vmem:[%s4690_s0 + $0xa0] sm:$0xff]  ;;  %v1347_v55 = vld [vmem:[%s4690_s0 + $0x4b8] sm:$0xff] }
 0x3aa   :  { %v1471_v20 = vmul.f32 %v1215_v47, %v3254_v23  ;;  %v1994_v21 = vadd.f32 %v1993_v11, %v1992_v12  ;;  %v1714_v10 = vadd.f32 %v1713_v61, %v1466_v8  ;;  %v1792_v49 = vadd.f32 %v1791_v15, %v1790_v19  ;;  %v1218_v19 = vld [vmem:[%s4690_s0 + $0xb0] sm:$0xff] }
 0x3ab   :  { %v3545_v54 = vpop.permute.xlu0 %1123  ;;  %v3547_v7 = vpop.permute.xlu1 %855  ;;  %v1601_v52 = vmul.f32 %v1345_v62, %v3258_v24  ;;  %v1793_v57 = vsel %vm1777_vm2, %v1469_v16, 0.0  ;;  %v1598_v46 = vmul.f32 %v1342_v53, %v3252_v22  ;;  %v1470_v59 = vmul.f32 %v1214_v13, %v3254_v23  ;;  %v1346_v16 = vld [vmem:[%s4690_s0 + $0x4b0] sm:$0xff] }
 0x3ac   :  { %4734 = vst [vmem:[#allocation23_spill] sm:$0xff] %v3547_v7  ;;  %v1473_v48 = vmul.f32 %v1217_v5, %v3260_v25  ;;  %v1918_v8 = vadd.f32 %v1917_v56, %v1596_v4  ;;  %v1996_v47 = vadd.f32 %v1995_v9, %v1994_v21  ;;  %v1715_v12 = vadd.f32 %v1714_v10, %v1468_v63  ;;  %v1348_v5 = vld [vmem:[%s4690_s0 + $0x4c0] sm:$0xff]  ;;  %v1349_v56 = vld [vmem:[%s4690_s0 + $0x4c8] sm:$0xff] }
 0x3ad   :  { %1178 = vbcast.lane.b32.xlu0 %v3170_v3, 344  ;;  %910 = vbcast.lane.b32.xlu1 %v3168_v2, 344  ;;  %v1997_v11 = vsel %vm1777_vm2, %v1599_v6, 0.0  ;;  %v1795_v15 = vsel %vm1777_vm2, %v1471_v20, 0.0  ;;  %v1600_v22 = vmul.f32 %v1344_v51, %v3258_v24  ;;  %v1472_v23 = vmul.f32 %v1216_v0, %v3260_v25  ;;  %v1221_v9 = vld [vmem:[%s4690_s0 + $0xc8] sm:$0xff]  ;;  %v1351_v0 = vld [vmem:[%s4690_s0 + $0x4d8] sm:$0xff] }
 0x3ae   :  { %v1603_v62 = vmul.f32 %v1347_v55, %v3264_v26  ;;  %v1794_v4 = vadd.f32 %v1793_v57, %v1792_v49  ;;  %v1999_v63 = vsel %vm1777_vm2, %v1601_v52, 0.0  ;;  %v1475_v24 = vmul.f32 %v1219_v58, %v3266_v27  ;;  %v1220_v52 = vld [vmem:[%s4690_s0 + $0xc0] sm:$0xff]  ;;  %v1223_v55 = vld [vmem:[%s4690_s0 + $0xd8] sm:$0xff] }
 0x3af   :  { %v3582_v18 = vpop.permute.xlu0 %1127  ;;  %v3584_v61 = vpop.permute.xlu1 %859  ;;  %v1919_v25 = vadd.f32 %v1918_v8, %v1598_v46  ;;  %v1998_v53 = vadd.f32 %v1997_v11, %v1996_v47  ;;  %v1716_v6 = vadd.f32 %v1715_v12, %v1470_v59  ;;  %v1797_v13 = vsel %vm1777_vm2, %v1473_v48, 0.0  ;;  %v1350_v12 = vld [vmem:[%s4690_s0 + $0x4d0] sm:$0xff] }
 0x3b0   :  { %4735 = vst [vmem:[#allocation24_spill] sm:$0xff] %v3582_v18  ;;  %4736 = vst [vmem:[#allocation25_spill] sm:$0xff] %v3584_v61  ;;  %v1796_v10 = vadd.f32 %v1795_v15, %v1794_v4  ;;  %v1602_v49 = vmul.f32 %v1346_v16, %v3264_v26  ;;  %v1474_v51 = vmul.f32 %v1218_v19, %v3266_v27  ;;  %v2001_v48 = vsel %vm1777_vm2, %v1603_v62, 0.0  ;;  %v2228_v26 = vld [vmem:[%s4693_s3] ss:$0 sm:$0xff]  ;;  %v1222_v11 = vld [vmem:[%s4690_s0 + $0xd0] sm:$0xff] }
 0x3b1   :  { %1182 = vbcast.lane.b32.xlu0 %v3170_v3, 352  ;;  %914 = vbcast.lane.b32.xlu1 %v3168_v2, 352  ;;  %v1920_v57 = vadd.f32 %v1919_v25, %v1600_v22  ;;  %v2000_v46 = vadd.f32 %v1999_v63, %v1998_v53  ;;  %v1717_v59 = vadd.f32 %v1716_v6, %v1472_v23  ;;  %v1799_v58 = vsel %vm1777_vm2, %v1475_v24, 0.0  ;;  %v1353_v62 = vld [vmem:[%s4690_s0 + $0x4e8] sm:$0xff]  ;;  %v1374_v18 = vld [vmem:[%s4690_s0 + $0x590] sm:$0xff] }
 0x3b2   :  { %v1798_v27 = vadd.f32 %v1797_v13, %v1796_v10  ;;  %v1605_v8 = vmul.f32 %v1349_v56, %v3270_v28  ;;  %v1477_v47 = vmul.f32 %v1221_v9, %v3272_v29  ;;  %v1604_v15 = vmul.f32 %v1348_v5, %v3270_v28  ;;  %v1225_v19 = vld [vmem:[%s4690_s0 + $0xe8] sm:$0xff]  ;;  %v1224_v56 = vld [vmem:[%s4690_s0 + $0xe0] sm:$0xff]  ;;  %v1355_v9 = vld [vmem:[%s4690_s0 + $0x4f8] sm:$0xff] }
 0x3b3   :  { %v3611_v20 = vpop.permute.xlu0 %1000  ;;  %v3613_v21 = vpop.permute.xlu1 %732  ;;  %v1476_v22 = vmul.f32 %v1220_v52, %v3272_v29  ;;  %v1607_v23 = vmul.f32 %v1351_v0, %v3276_v30  ;;  %v1479_v16 = vmul.f32 %v1223_v55, %v3278_v31  ;;  %v1921_v24 = vadd.f32 %v1920_v57, %v1602_v49  ;;  %v1352_v29 = vld [vmem:[%s4690_s0 + $0x4e0] sm:$0xff]  ;;  %v1227_v10 = vld [vmem:[%s4690_s0 + $0xf8] sm:$0xff]  ;;  %v1354_v57 = vld [vmem:[%s4690_s0 + $0x4f0] sm:$0xff] }
 0x3b4   :  { %v2002_v28 = vadd.f32 %v2001_v48, %v2000_v46  ;;  %v1718_v25 = vadd.f32 %v1717_v59, %v1474_v51  ;;  %v655_v53 = vmul.f32 %v2228_v26, %v3152_v50  ;;  %v1800_v6 = vadd.f32 %v1799_v58, %v1798_v27  ;;  %v1226_v46 = vld [vmem:[%s4690_s0 + $0xf0] sm:$0xff] }
 0x3b5   :  { %1186 = vbcast.lane.b32.xlu0 %v3170_v3, 360  ;;  %918 = vbcast.lane.b32.xlu1 %v3168_v2, 360  ;;  %v1606_v13 = vmul.f32 %v1350_v12, %v3276_v30  ;;  %v1478_v5 = vmul.f32 %v1222_v11, %v3278_v31  ;;  %v2003_v50 = vsel %vm1777_vm2, %v1605_v8, 0.0  ;;  %v1801_v30 = vsel %vm1777_vm2, %v1477_v47, 0.0 }
 0x3b6   :  { %v1609_v31 = vmul.f32 %v1353_v62, %v3282_v32  ;;  %v1481_v49 = vmul.f32 %v1225_v19, %v3284_v33  ;;  %v1922_v51 = vadd.f32 %v1921_v24, %v1604_v15  ;;  %v1719_v52 = vadd.f32 %v1718_v25, %v1476_v22  ;;  %v1261_v62 = vld [vmem:[%s4690_s0 + $0x208] sm:$0xff] }
 0x3b7   :  { %v3651_v4 = vpop.permute.xlu0 %1004  ;;  %v3653_v63 = vpop.permute.xlu1 %736  ;;  %v2005_v0 = vsel %vm1777_vm2, %v1607_v23, 0.0  ;;  %v1803_v55 = vsel %vm1777_vm2, %v1479_v16, 0.0  ;;  %v1608_v26 = vmul.f32 %v1352_v29, %v3282_v32  ;;  %v1480_v27 = vmul.f32 %v1224_v56, %v3284_v33  ;;  %v1389_v33 = vld [vmem:[%s4690_s0 + $0x608] sm:$0xff] }
 0x3b8   :  { %v1611_v58 = vmul.f32 %v1355_v9, %v3288_v34  ;;  %v1483_v8 = vmul.f32 %v1227_v10, %v3290_v35  ;;  %v2004_v47 = vadd.f32 %v2003_v50, %v2002_v28  ;;  %v1802_v12 = vadd.f32 %v1801_v30, %v1800_v6  ;;  %v1388_v6 = vld [vmem:[%s4690_s0 + $0x600] sm:$0xff] }
 0x3b9   :  { %1190 = vbcast.lane.b32.xlu0 %v3170_v3, 368  ;;  %922 = vbcast.lane.b32.xlu1 %v3168_v2, 368  ;;  %v1923_v11 = vadd.f32 %v1922_v51, %v1606_v13  ;;  %v1720_v15 = vadd.f32 %v1719_v52, %v1478_v5  ;;  %v2007_v22 = vsel %vm1777_vm2, %v1609_v31, 0.0  ;;  %v1805_v23 = vsel %vm1777_vm2, %v1481_v49, 0.0  ;;  %v1391_v13 = vld [vmem:[%s4690_s0 + $0x618] sm:$0xff]  ;;  %v1260_v50 = vld [vmem:[%s4690_s0 + $0x200] sm:$0xff] }
 0x3ba   :  { %v1610_v16 = vmul.f32 %v1354_v57, %v3288_v34  ;;  %v1482_v32 = vmul.f32 %v1226_v46, %v3290_v35  ;;  %v2006_v19 = vadd.f32 %v2005_v0, %v2004_v47  ;;  %v1804_v24 = vadd.f32 %v1803_v55, %v1802_v12  ;;  %v1263_v5 = vld [vmem:[%s4690_s0 + $0x218] sm:$0xff]  ;;  %v1393_v31 = vld [vmem:[%s4690_s0 + $0x628] sm:$0xff]  ;;  %v1390_v0 = vld [vmem:[%s4690_s0 + $0x610] sm:$0xff] }
 0x3bb   :  { %v3684_v59 = vpop.permute.xlu0 %1008  ;;  %v3686_v48 = vpop.permute.xlu1 %740  ;;  %v1924_v25 = vadd.f32 %v1923_v11, %v1608_v26  ;;  %v1721_v29 = vadd.f32 %v1720_v15, %v1480_v27  ;;  %v2009_v34 = vsel %vm1777_vm2, %v1611_v58, 0.0  ;;  %v1807_v35 = vsel %vm1777_vm2, %v1483_v8, 0.0  ;;  %v1265_v49 = vld [vmem:[%s4690_s0 + $0x228] sm:$0xff]  ;;  %v1262_v58 = vld [vmem:[%s4690_s0 + $0x210] sm:$0xff]  ;;  %v1356_v47 = vld [vmem:[%s4690_s0 + $0x500] sm:$0xff] }
 0x3bc   :  { %v2008_v56 = vadd.f32 %v2007_v22, %v2006_v19  ;;  %v1806_v9 = vadd.f32 %v1805_v23, %v1804_v24  ;;  %v1645_v10 = vmul.f32 %v1389_v33, %v3294_v36  ;;  %v1517_v30 = vmul.f32 %v1261_v62, %v3296_v37  ;;  %v1357_v55 = vld [vmem:[%s4690_s0 + $0x508] sm:$0xff]  ;;  %v1228_v12 = vld [vmem:[%s4690_s0 + $0x100] sm:$0xff]  ;;  %v1231_v33 = vld [vmem:[%s4690_s0 + $0x118] sm:$0xff] }
 0x3bd   :  { %1194 = vbcast.lane.b32.xlu0 %v3170_v3, 376  ;;  %v1925_v51 = vadd.f32 %v1924_v25, %v1610_v16  ;;  %v1722_v52 = vadd.f32 %v1721_v29, %v1482_v32  ;;  %v1229_v57 = vld [vmem:[%s4690_s0 + $0x108] sm:$0xff]  ;;  %v3740_v46 = vsel %vm656_vm3, %v655_v53, 0.0  ;;  %v1519_v8 = vmul.f32 %v1263_v5, %v3302_v39  ;;  %v1359_v32 = vld [vmem:[%s4690_s0 + $0x518] sm:$0xff]  ;;  %v1264_v19 = vld [vmem:[%s4690_s0 + $0x220] sm:$0xff] }
 0x3be   :  { %v2010_v26 = vadd.f32 %v2009_v34, %v2008_v56  ;;  %v1808_v27 = vadd.f32 %v1807_v35, %v1806_v9  ;;  %v3758_v15 = vmul.f32 %v1388_v6, %v3294_v36  ;;  %v3761_v22 = vmul.f32 %v1260_v50, %v3296_v37  ;;  %v1392_v37 = vld [vmem:[%s4690_s0 + $0x620] sm:$0xff]  ;;  %v1394_v35 = vld [vmem:[%s4690_s0 + $0x630] sm:$0xff]  ;;  %v1395_v6 = vld [vmem:[%s4690_s0 + $0x638] sm:$0xff] }
 0x3bf   :  { %v3703_v28 = vpop.permute.xlu0 %1012  ;;  %v3705_v3 = vpop.permute.xlu1 %744  ;;  %v1649_v23 = vmul.f32 %v1393_v31, %v3306_v40  ;;  %v1521_v16 = vmul.f32 %v1265_v49, %v3308_v41  ;;  %v3772_v62 = vsel %vm1777_vm2, %v1645_v10, 0.0  ;;  %v3775_v36 = vsel %vm1777_vm2, %v1517_v30, 0.0  ;;  %v1230_v10 = vld [vmem:[%s4690_s0 + $0x110] sm:$0xff] }
 0x3c0   :  { %v1613_v24 = vmul.f32 %v1357_v55, %v3611_v20  ;;  %v1485_v25 = vmul.f32 %v1229_v57, %v3613_v21  ;;  %v3786_v29 = vmul.f32 %v1390_v0, %v3300_v38  ;;  %v3789_v34 = vmul.f32 %v1262_v58, %v3302_v39  ;;  %v1358_v39 = vld [vmem:[%s4690_s0 + $0x510] sm:$0xff]  ;;  %v1361_v55 = vld [vmem:[%s4690_s0 + $0x528] sm:$0xff] }
 0x3c1   :  { %926 = vbcast.lane.b32.xlu0 %v3168_v2, 376  ;;  %v1647_v2 = vmul.f32 %v1391_v13, %v3300_v38  ;;  %v1612_v13 = vmul.f32 %v1356_v47, %v3611_v20  ;;  %v1484_v5 = vmul.f32 %v1228_v12, %v3613_v21  ;;  %v3803_v38 = vsel %vm1777_vm2, %v1519_v8, 0.0  ;;  %v1233_v57 = vld [vmem:[%s4690_s0 + $0x128] sm:$0xff]  ;;  %v1360_v47 = vld [vmem:[%s4690_s0 + $0x520] sm:$0xff] }
 0x3c2   :  { %v1615_v9 = vmul.f32 %v1359_v32, %v3651_v4  ;;  %v1487_v20 = vmul.f32 %v1231_v33, %v3653_v63  ;;  %v3818_v30 = vmul.f32 %v1392_v37, %v3306_v40  ;;  %v3821_v31 = vsel %vm1777_vm2, %v1649_v23, 0.0  ;;  %v1232_v12 = vld [vmem:[%s4690_s0 + $0x120] sm:$0xff]  ;;  %v1363_v37 = vld [vmem:[%s4690_s0 + $0x538] sm:$0xff] }
 0x3c3   :  { %v3753_v53 = vpop.permute.xlu0 %1016  ;;  %v3755_v11 = vpop.permute.xlu1 %748  ;;  %v3800_v56 = vsel %vm1777_vm2, %v1647_v2, 0.0  ;;  %v3824_v49 = vmul.f32 %v1264_v19, %v3308_v41  ;;  %v3827_v0 = vsel %vm1777_vm2, %v1521_v16, 0.0  ;;  %v3836_v40 = vmul.f32 %v1394_v35, %v3312_v42  ;;  %v1266_v41 = vld [vmem:[%s4690_s0 + $0x230] sm:$0xff]  ;;  %v1235_v19 = vld [vmem:[%s4690_s0 + $0x138] sm:$0xff] }
 0x3c4   :  { %v1651_v2 = vmul.f32 %v1395_v6, %v3312_v42  ;;  %v2011_v58 = vsel %vm1777_vm2, %v1613_v24, 0.0  ;;  %v1809_v8 = vsel %vm1777_vm2, %v1485_v25, 0.0  ;;  %v1267_v42 = vld [vmem:[%s4690_s0 + $0x238] sm:$0xff]  ;;  %v1926_v23 = vadd.f32 %v1925_v51, %v1612_v13 }
 0x3c5   :  { %v1723_v16 = vadd.f32 %v1722_v52, %v1484_v5  ;;  %v1614_v32 = vmul.f32 %v1358_v39, %v3651_v4  ;;  %v1486_v33 = vmul.f32 %v1230_v10, %v3653_v63  ;;  %v2013_v24 = vsel %vm1777_vm2, %v1615_v9, 0.0  ;;  %v1362_v39 = vld [vmem:[%s4690_s0 + $0x530] sm:$0xff] }
 0x3c6   :  { %v1811_v25 = vsel %vm1777_vm2, %v1487_v20, 0.0  ;;  %v1617_v35 = vmul.f32 %v1361_v55, %v3684_v59  ;;  %v1489_v51 = vmul.f32 %v1233_v57, %v3686_v48  ;;  %v2012_v63 = vadd.f32 %v2011_v58, %v2010_v26  ;;  %v1234_v9 = vld [vmem:[%s4690_s0 + $0x130] sm:$0xff] }
 0x3c7   :  { %v3813_v50 = vpop.permute.xlu0 %1020  ;;  %v3815_v21 = vpop.permute.xlu1 %752  ;;  %v1810_v6 = vadd.f32 %v1809_v8, %v1808_v27  ;;  %v1616_v13 = vmul.f32 %v1360_v47, %v3684_v59  ;;  %v1488_v5 = vmul.f32 %v1232_v12, %v3686_v48  ;;  %v3878_v10 = vmul.f32 %v1266_v41, %v3314_v43  ;;  %v1365_v59 = vld [vmem:[%s4690_s0 + $0x548] sm:$0xff]  ;;  %v1236_v41 = vld [vmem:[%s4690_s0 + $0x140] sm:$0xff] }
 0x3c8   :  { %v1523_v20 = vmul.f32 %v1267_v42, %v3314_v43  ;;  %v1619_v26 = vmul.f32 %v1363_v37, %v3703_v28  ;;  %v1491_v27 = vmul.f32 %v1235_v19, %v3705_v3  ;;  %v1237_v48 = vld [vmem:[%s4690_s0 + $0x148] sm:$0xff]  ;;  %v1927_v55 = vadd.f32 %v1926_v23, %v1614_v32  ;;  %v1364_v43 = vld [vmem:[%s4690_s0 + $0x540] sm:$0xff]  ;;  %v1367_v23 = vld [vmem:[%s4690_s0 + $0x558] sm:$0xff] }
 0x3c9   :  { %v2014_v57 = vadd.f32 %v2013_v24, %v2012_v63  ;;  %v1724_v58 = vadd.f32 %v1723_v16, %v1486_v33  ;;  %v1812_v8 = vadd.f32 %v1811_v25, %v1810_v6  ;;  %v2015_v47 = vsel %vm1777_vm2, %v1617_v35, 0.0  ;;  %v1239_v16 = vld [vmem:[%s4690_s0 + $0x158] sm:$0xff] }
 0x3ca   :  { %v1813_v12 = vsel %vm1777_vm2, %v1489_v51, 0.0  ;;  %v1618_v42 = vmul.f32 %v1362_v39, %v3703_v28  ;;  %v1490_v37 = vmul.f32 %v1234_v9, %v3705_v3  ;;  %v1928_v19 = vadd.f32 %v1927_v55, %v1616_v13  ;;  %v1366_v9 = vld [vmem:[%s4690_s0 + $0x550] sm:$0xff]  ;;  %v1241_v55 = vld [vmem:[%s4690_s0 + $0x168] sm:$0xff] }
 0x3cb   :  { %v3865_v52 = vpop.permute.xlu0 %1024  ;;  %v3867_v4 = vpop.permute.xlu1 %756  ;;  %v1725_v24 = vadd.f32 %v1724_v58, %v1488_v5  ;;  %v1621_v25 = vmul.f32 %v1365_v59, %v3753_v53  ;;  %v1493_v28 = vmul.f32 %v1237_v48, %v3755_v11  ;;  %v2017_v3 = vsel %vm1777_vm2, %v1619_v26, 0.0  ;;  %v1238_v5 = vld [vmem:[%s4690_s0 + $0x150] sm:$0xff]  ;;  %v1369_v48 = vld [vmem:[%s4690_s0 + $0x568] sm:$0xff] }
 0x3cc   :  { %v1815_v35 = vsel %vm1777_vm2, %v1491_v27, 0.0  ;;  %v1620_v51 = vmul.f32 %v1364_v43, %v3753_v53  ;;  %v1492_v63 = vmul.f32 %v1236_v41, %v3755_v11  ;;  %v2016_v6 = vadd.f32 %v2015_v47, %v2014_v57  ;;  %v1368_v47 = vld [vmem:[%s4690_s0 + $0x560] sm:$0xff] }
 0x3cd   :  { %v1814_v39 = vadd.f32 %v1813_v12, %v1812_v8  ;;  %v1623_v13 = vmul.f32 %v1367_v23, %v3813_v50  ;;  %v1495_v26 = vmul.f32 %v1239_v16, %v3815_v21  ;;  %v3924_v27 = vsel %vm1777_vm2, %v1651_v2, 0.0  ;;  %v1396_v2 = vld [vmem:[%s4690_s0 + $0x640] sm:$0xff] }
 0x3ce   :  { %v3927_v53 = vsel %vm1777_vm2, %v1523_v20, 0.0  ;;  %v1929_v11 = vadd.f32 %v1928_v19, %v1618_v42  ;;  %v1726_v59 = vadd.f32 %v1725_v24, %v1490_v37  ;;  %v2018_v8 = vadd.f32 %v2017_v3, %v2016_v6  ;;  %v1240_v12 = vld [vmem:[%s4690_s0 + $0x160] sm:$0xff]  ;;  %v1397_v42 = vld [vmem:[%s4690_s0 + $0x648] sm:$0xff]  ;;  %v1371_v24 = vld [vmem:[%s4690_s0 + $0x578] sm:$0xff] }
 0x3cf   :  { %v3905_v32 = vpop.permute.xlu0 %1028  ;;  %v3907_v33 = vpop.permute.xlu1 %760  ;;  %v1816_v43 = vadd.f32 %v1815_v35, %v1814_v39  ;;  %v2019_v20 = vsel %vm1777_vm2, %v1621_v25, 0.0  ;;  %v1817_v41 = vsel %vm1777_vm2, %v1493_v28, 0.0  ;;  %v1622_v16 = vmul.f32 %v1366_v9, %v3813_v50  ;;  %v1243_v25 = vld [vmem:[%s4690_s0 + $0x178] sm:$0xff]  ;;  %v1370_v39 = vld [vmem:[%s4690_s0 + $0x570] sm:$0xff] }
 0x3d0   :  { %v1930_v37 = vadd.f32 %v1929_v11, %v1620_v51  ;;  %v1727_v23 = vadd.f32 %v1726_v59, %v1492_v63  ;;  %v1494_v19 = vmul.f32 %v1238_v5, %v3815_v21  ;;  %v2021_v28 = vsel %vm1777_vm2, %v1623_v13, 0.0  ;;  %v1242_v9 = vld [vmem:[%s4690_s0 + $0x170] sm:$0xff] }
 0x3d1   :  { %v1819_v3 = vsel %vm1777_vm2, %v1495_v26, 0.0  ;;  %v1625_v35 = vmul.f32 %v1369_v48, %v3865_v52  ;;  %v1497_v51 = vmul.f32 %v1241_v55, %v3867_v4  ;;  %v2020_v63 = vadd.f32 %v2019_v20, %v2018_v8  ;;  %v4737_v26 = vld [vmem:[#allocation9_spill] sm:$0xff] }
 0x3d2   :  { %v1818_v50 = vadd.f32 %v1817_v41, %v1816_v43  ;;  %v1624_v21 = vmul.f32 %v1368_v47, %v3865_v52  ;;  %v1496_v6 = vmul.f32 %v1240_v12, %v3867_v4  ;;  %v3970_v11 = vmul.f32 %v1396_v2, %v4737_v26  ;;  %v1373_v48 = vld [vmem:[%s4690_s0 + $0x588] sm:$0xff]  ;;  %v1372_v41 = vld [vmem:[%s4690_s0 + $0x580] sm:$0xff] }
 0x3d3   :  { %v1033_v57 = vpop.permute.xlu0 %1032  ;;  %v765_v58 = vpop.permute.xlu1 %764  ;;  %v3973_v59 = vmul.f32 %v1397_v42, %v4737_v26  ;;  %v1627_v52 = vmul.f32 %v1371_v24, %v3905_v32  ;;  %v1499_v4 = vmul.f32 %v1243_v25, %v3907_v33  ;;  %v1245_v55 = vld [vmem:[%s4690_s0 + $0x188] sm:$0xff]  ;;  %v1931_v8 = vadd.f32 %v1930_v37, %v1622_v16  ;;  %v1244_v47 = vld [vmem:[%s4690_s0 + $0x180] sm:$0xff]  ;;  %v1375_v37 = vld [vmem:[%s4690_s0 + $0x598] sm:$0xff] }
 0x3d4   :  { %v2022_v43 = vadd.f32 %v2021_v28, %v2020_v63  ;;  %v1728_v20 = vadd.f32 %v1727_v23, %v1494_v19  ;;  %v1820_v2 = vadd.f32 %v1819_v3, %v1818_v50  ;;  %v2023_v12 = vsel %vm1777_vm2, %v1625_v35, 0.0  ;;  %v1247_v23 = vld [vmem:[%s4690_s0 + $0x198] sm:$0xff]  ;;  %v1268_v16 = vld [vmem:[%s4690_s0 + $0x240] sm:$0xff]  ;;  %v1269_v19 = vld [vmem:[%s4690_s0 + $0x248] sm:$0xff] }
 0x3d5   :  { %v1821_v42 = vsel %vm1777_vm2, %v1497_v51, 0.0  ;;  %v1626_v24 = vmul.f32 %v1370_v39, %v3905_v32  ;;  %v1498_v25 = vmul.f32 %v1242_v9, %v3907_v33  ;;  %v1932_v28 = vadd.f32 %v1931_v8, %v1624_v21  ;;  %v1246_v21 = vld [vmem:[%s4690_s0 + $0x190] sm:$0xff]  ;;  %v1249_v8 = vld [vmem:[%s4690_s0 + $0x1a8] sm:$0xff] }
 0x3d6   :  { %v1729_v32 = vadd.f32 %v1728_v20, %v1496_v6  ;;  %v1629_v3 = vmul.f32 %v1373_v48, %v1033_v57  ;;  %v1501_v33 = vmul.f32 %v1245_v55, %v765_v58  ;;  %v2025_v63 = vsel %vm1777_vm2, %v1627_v52, 0.0  ;;  %v4738_v48 = vld [vmem:[#allocation10_spill] sm:$0xff]  ;;  %v1377_v55 = vld [vmem:[%s4690_s0 + $0x5a8] sm:$0xff] }
 0x3d7   :  { %v1037_v13 = vpop.permute.xlu0 %1036  ;;  %v769_v5 = vpop.permute.xlu1 %768  ;;  %v1823_v50 = vsel %vm1777_vm2, %v1499_v4, 0.0  ;;  %v1628_v39 = vmul.f32 %v1372_v41, %v1033_v57  ;;  %v1500_v9 = vmul.f32 %v1244_v47, %v765_v58  ;;  %v2024_v26 = vadd.f32 %v2023_v12, %v2022_v43  ;;  %v1376_v41 = vld [vmem:[%s4690_s0 + $0x5a0] sm:$0xff] }
 0x3d8   :  { %v1822_v61 = vadd.f32 %v1821_v42, %v1820_v2  ;;  %v1631_v7 = vmul.f32 %v1375_v37, %v1037_v13  ;;  %v1503_v6 = vmul.f32 %v1247_v23, %v769_v5  ;;  %v4015_v52 = vmul.f32 %v1268_v16, %v4738_v48  ;;  %v1248_v47 = vld [vmem:[%s4690_s0 + $0x1a0] sm:$0xff]  ;;  %v1251_v16 = vld [vmem:[%s4690_s0 + $0x1b8] sm:$0xff] }
 0x3d9   :  { %v1525_v57 = vmul.f32 %v1269_v19, %v4738_v48  ;;  %v1933_v58 = vadd.f32 %v1932_v28, %v1626_v24  ;;  %v1730_v4 = vadd.f32 %v1729_v32, %v1498_v25  ;;  %v2026_v43 = vadd.f32 %v2025_v63, %v2024_v26 }
 0x3da   :  { %v1824_v20 = vadd.f32 %v1823_v50, %v1822_v61  ;;  %v2027_v2 = vsel %vm1777_vm2, %v1629_v3, 0.0  ;;  %v1630_v37 = vmul.f32 %v1374_v18, %v1037_v13  ;;  %v1502_v23 = vmul.f32 %v1246_v21, %v769_v5  ;;  %v1379_v61 = vld [vmem:[%s4690_s0 + $0x5b8] sm:$0xff]  ;;  %v1378_v18 = vld [vmem:[%s4690_s0 + $0x5b0] sm:$0xff]  ;;  %v1253_v21 = vld [vmem:[%s4690_s0 + $0x1c8] sm:$0xff] }
 0x3db   :  { %v1041_v35 = vpop.permute.xlu0 %1040  ;;  %v773_v51 = vpop.permute.xlu1 %772  ;;  %v1934_v24 = vadd.f32 %v1933_v58, %v1628_v39  ;;  %v1731_v25 = vadd.f32 %v1730_v4, %v1500_v9  ;;  %v2029_v19 = vsel %vm1777_vm2, %v1631_v7, 0.0  ;;  %v1827_v28 = vsel %vm1777_vm2, %v1503_v6, 0.0  ;;  %v1250_v13 = vld [vmem:[%s4690_s0 + $0x1b0] sm:$0xff] }
 0x3dc   :  { %v1633_v32 = vmul.f32 %v1377_v55, %v1041_v35  ;;  %v1505_v3 = vmul.f32 %v1249_v8, %v773_v51  ;;  %v1632_v50 = vmul.f32 %v1376_v41, %v1041_v35  ;;  %v1504_v39 = vmul.f32 %v1248_v47, %v773_v51  ;;  %v1381_v35 = vld [vmem:[%s4690_s0 + $0x5c8] sm:$0xff]  ;;  %v1252_v55 = vld [vmem:[%s4690_s0 + $0x1c0] sm:$0xff]  ;;  %v1255_v41 = vld [vmem:[%s4690_s0 + $0x1d8] sm:$0xff] }
 0x3dd   :  { %658 = vadd.xlane.f32.xlu1 %v3740_v46  ;;  %v1825_v46 = vsel %vm1777_vm2, %v1501_v33, 0.0  ;;  %v2028_v33 = vadd.f32 %v2027_v2, %v2026_v43  ;;  %v4048_v5 = vsel %vm1777_vm2, %v3973_v59, 0.0  ;;  %v4051_v7 = vsel %vm1777_vm2, %v1525_v57, 0.0  ;;  %v1380_v57 = vld [vmem:[%s4690_s0 + $0x5c0] sm:$0xff] }
 0x3de   :  { %v1826_v63 = vadd.f32 %v1825_v46, %v1824_v20  ;;  %v1935_v48 = vadd.f32 %v1934_v24, %v1630_v37  ;;  %v1732_v4 = vadd.f32 %v1731_v25, %v1502_v23  ;;  %v2031_v8 = vsel %vm1777_vm2, %v1633_v32, 0.0  ;;  %v1383_v46 = vld [vmem:[%s4690_s0 + $0x5d8] sm:$0xff]  ;;  %v1382_v23 = vld [vmem:[%s4690_s0 + $0x5d0] sm:$0xff] }
 0x3df   :  { %v1045_v12 = vpop.permute.xlu0 %1044  ;;  %v777_v42 = vpop.permute.xlu1 %776  ;;  %v2030_v58 = vadd.f32 %v2029_v19, %v2028_v33  ;;  %v1829_v43 = vsel %vm1777_vm2, %v1505_v3, 0.0 }
 0x3e0   :  { %v1635_v9 = vmul.f32 %v1379_v61, %v1045_v12  ;;  %v1507_v26 = vmul.f32 %v1251_v16, %v777_v42  ;;  %v1828_v59 = vadd.f32 %v1827_v28, %v1826_v63  ;;  %v1634_v20 = vmul.f32 %v1378_v18, %v1045_v12  ;;  %v1254_v12 = vld [vmem:[%s4690_s0 + $0x1d0] sm:$0xff] }
 0x3e1   :  { %v1506_v2 = vmul.f32 %v1250_v13, %v777_v42  ;;  %v1936_v47 = vadd.f32 %v1935_v48, %v1632_v50  ;;  %v1733_v24 = vadd.f32 %v1732_v4, %v1504_v39  ;;  %v2032_v3 = vadd.f32 %v2031_v8, %v2030_v58  ;;  %v1384_v39 = vld [vmem:[%s4690_s0 + $0x5e0] sm:$0xff] }
 0x3e2   :  { %v2033_v42 = vsel %vm1777_vm2, %v1635_v9, 0.0  ;;  %v1831_v61 = vsel %vm1777_vm2, %v1507_v26, 0.0  ;;  %v1830_v33 = vadd.f32 %v1829_v43, %v1828_v59  ;;  %v1385_v9 = vld [vmem:[%s4690_s0 + $0x5e8] sm:$0xff]  ;;  %v1256_v26 = vld [vmem:[%s4690_s0 + $0x1e0] sm:$0xff]  ;;  %v1399_v59 = vld [vmem:[%s4690_s0 + $0x658] sm:$0xff] }
 0x3e3   :  { %v1049_v51 = vpop.permute.xlu0 %1048  ;;  %v781_v6 = vpop.permute.xlu1 %780  ;;  %v1937_v18 = vadd.f32 %v1936_v47, %v1634_v20  ;;  %v1734_v13 = vadd.f32 %v1733_v24, %v1506_v2 }
 0x3e4   :  { %v1637_v25 = vmul.f32 %v1381_v35, %v1049_v51  ;;  %v1509_v37 = vmul.f32 %v1253_v21, %v781_v6  ;;  %v1636_v16 = vmul.f32 %v1380_v57, %v1049_v51  ;;  %v1508_v19 = vmul.f32 %v1252_v55, %v781_v6  ;;  %v1257_v51 = vld [vmem:[%s4690_s0 + $0x1e8] sm:$0xff]  ;;  %v1271_v57 = vld [vmem:[%s4690_s0 + $0x258] sm:$0xff] }
 0x3e5   :  { %v2034_v6 = vadd.f32 %v2033_v42, %v2032_v3  ;;  %v1832_v48 = vadd.f32 %v1831_v61, %v1830_v33  ;;  %v4739_v3 = vld [vmem:[#allocation11_spill] sm:$0xff] }
 0x3e6   :  { %v2035_v58 = vsel %vm1777_vm2, %v1637_v25, 0.0  ;;  %v1833_v4 = vsel %vm1777_vm2, %v1509_v37, 0.0  ;;  %v1938_v55 = vadd.f32 %v1937_v18, %v1636_v16  ;;  %v1735_v8 = vadd.f32 %v1734_v13, %v1508_v19  ;;  %v1386_v37 = vld [vmem:[%s4690_s0 + $0x5f0] sm:$0xff]  ;;  %v1387_v16 = vld [vmem:[%s4690_s0 + $0x5f8] sm:$0xff] }
 0x3e7   :  { %v1053_v28 = vpop.permute.xlu0 %1052  ;;  %v785_v32 = vpop.permute.xlu1 %784  ;;  %v1258_v19 = vld [vmem:[%s4690_s0 + $0x1f0] sm:$0xff]  ;;  %v1655_v33 = vmul.f32 %v1399_v59, %v4739_v3 }
 0x3e8   :  { %v1639_v63 = vmul.f32 %v1383_v46, %v1053_v28  ;;  %v1511_v50 = vmul.f32 %v1255_v41, %v785_v32  ;;  %v1638_v35 = vmul.f32 %v1382_v23, %v1053_v28  ;;  %v1510_v21 = vmul.f32 %v1254_v12, %v785_v32  ;;  %v1259_v28 = vld [vmem:[%s4690_s0 + $0x1f8] sm:$0xff]  ;;  %v1398_v32 = vld [vmem:[%s4690_s0 + $0x650] sm:$0xff] }
 0x3e9   :  { %v2036_v23 = vadd.f32 %v2035_v58, %v2034_v6  ;;  %v1834_v12 = vadd.f32 %v1833_v4, %v1832_v48  ;;  %v1401_v48 = vld [vmem:[%s4690_s0 + $0x668] sm:$0xff] }
 0x3ea   :  { %v2037_v43 = vsel %vm1777_vm2, %v1639_v63, 0.0  ;;  %v1835_v20 = vsel %vm1777_vm2, %v1511_v50, 0.0  ;;  %v1939_v42 = vadd.f32 %v1938_v55, %v1638_v35  ;;  %v1736_v61 = vadd.f32 %v1735_v8, %v1510_v21  ;;  %v1270_v63 = vld [vmem:[%s4690_s0 + $0x250] sm:$0xff]  ;;  %v4740_v50 = vld [vmem:[#allocation12_spill] sm:$0xff] }
 0x3eb   :  { %v1057_v2 = vpop.permute.xlu0 %1056  ;;  %v789_v46 = vpop.permute.xlu1 %788  ;;  %v2038_v35 = vadd.f32 %v2037_v43, %v2036_v23  ;;  %v1836_v21 = vadd.f32 %v1835_v20, %v1834_v12  ;;  %v1273_v58 = vld [vmem:[%s4690_s0 + $0x268] sm:$0xff]  ;;  %v4132_v8 = vmul.f32 %v1398_v32, %v4739_v3  ;;  %v4135_v43 = vmul.f32 %v1270_v63, %v4740_v50 }
 0x3ec   :  { %v1640_v41 = vmul.f32 %v1384_v39, %v1057_v2  ;;  %v1641_v47 = vmul.f32 %v1385_v9, %v1057_v2  ;;  %v1512_v24 = vmul.f32 %v1256_v26, %v789_v46  ;;  %v1513_v25 = vmul.f32 %v1257_v51, %v789_v46  ;;  %v1400_v46 = vld [vmem:[%s4690_s0 + $0x660] sm:$0xff]  ;;  %v4741_v23 = vld [vmem:[#allocation13_spill] sm:$0xff] }
 0x3ed   :  { %v1527_v39 = vmul.f32 %v1271_v57, %v4740_v50  ;;  %v1657_v12 = vmul.f32 %v1401_v48, %v4741_v23  ;;  %v4158_v50 = vsel %vm1777_vm2, %v1655_v33, 0.0  ;;  %v1274_v33 = vld [vmem:[%s4690_s0 + $0x270] sm:$0xff] }
 0x3ee   :  { %v2039_v18 = vsel %vm1777_vm2, %v1641_v47, 0.0  ;;  %v1837_v13 = vsel %vm1777_vm2, %v1513_v25, 0.0  ;;  %v1940_v9 = vadd.f32 %v1939_v42, %v1640_v41  ;;  %v1737_v26 = vadd.f32 %v1736_v61, %v1512_v24  ;;  %v1272_v41 = vld [vmem:[%s4690_s0 + $0x260] sm:$0xff]  ;;  %v4742_v42 = vld [vmem:[#allocation14_spill] sm:$0xff] }
 0x3ef   :  { %v1061_v51 = vpop.permute.xlu0 %1060  ;;  %v793_v6 = vpop.permute.xlu1 %792  ;;  %v2040_v20 = vadd.f32 %v2039_v18, %v2038_v35  ;;  %v1838_v2 = vadd.f32 %v1837_v13, %v1836_v21  ;;  %v1529_v61 = vmul.f32 %v1273_v58, %v4742_v42  ;;  %v4161_v18 = vsel %vm1777_vm2, %v1527_v39, 0.0  ;;  %v1405_v58 = vld [vmem:[%s4690_s0 + $0x688] sm:$0xff] }
 0x3f0   :  { %v1642_v4 = vmul.f32 %v1386_v37, %v1061_v51  ;;  %v1643_v59 = vmul.f32 %v1387_v16, %v1061_v51  ;;  %v1514_v57 = vmul.f32 %v1258_v19, %v793_v6  ;;  %v1515_v55 = vmul.f32 %v1259_v28, %v793_v6  ;;  %v1403_v16 = vld [vmem:[%s4690_s0 + $0x678] sm:$0xff]  ;;  %v4744_v6 = vld [vmem:[#allocation16_spill] sm:$0xff] }
 0x3f1   :  { %v1275_v19 = vld [vmem:[%s4690_s0 + $0x278] sm:$0xff]  ;;  %v4166_v21 = vmul.f32 %v1400_v46, %v4741_v23 }
 0x3f2   :  { %v1941_v47 = vadd.f32 %v1940_v9, %v1642_v4  ;;  %v2041_v24 = vsel %vm1777_vm2, %v1643_v59, 0.0  ;;  %v1738_v25 = vadd.f32 %v1737_v26, %v1514_v57  ;;  %v1839_v37 = vsel %vm1777_vm2, %v1515_v55, 0.0  ;;  %v1402_v26 = vld [vmem:[%s4690_s0 + $0x670] sm:$0xff]  ;;  %v4743_v51 = vld [vmem:[#allocation15_spill] sm:$0xff]  ;;  %v1277_v4 = vld [vmem:[%s4690_s0 + $0x288] sm:$0xff] }
 0x3f3   :  { %v2042_v28 = vadd.f32 %v2041_v24, %v2040_v20  ;;  %v1840_v32 = vadd.f32 %v1839_v37, %v1838_v2  ;;  %v4153_v3 = vpop.permute.xlu0 %1134  ;;  %v4155_v63 = vpop.permute.xlu1 %866  ;;  %v4169_v9 = vmul.f32 %v1272_v41, %v4742_v42  ;;  %v1531_v48 = vmul.f32 %v1275_v19, %v4744_v6  ;;  %v4745_v24 = vld [vmem:[#allocation17_spill] sm:$0xff]  ;;  %v1407_v23 = vld [vmem:[%s4690_s0 + $0x698] sm:$0xff] }
 0x3f4   :  { %v1942_v13 = vadd.f32 %v1941_v47, %v3758_v15  ;;  %v1739_v35 = vadd.f32 %v1738_v25, %v3761_v22  ;;  %v1659_v22 = vmul.f32 %v1403_v16, %v4743_v51  ;;  %v1658_v46 = vmul.f32 %v1402_v26, %v4743_v51  ;;  %v4746_v25 = vld [vmem:[#allocation18_spill] sm:$0xff]  ;;  %v1409_v51 = vld [vmem:[%s4690_s0 + $0x6a8] sm:$0xff] }
 0x3f5   :  { %v2044_v39 = vadd.f32 %v3772_v62, %v2042_v28  ;;  %v1842_v15 = vadd.f32 %v3775_v36, %v1840_v32  ;;  %v2055_v62 = vsel %vm1777_vm2, %v1657_v12, 0.0  ;;  %v1853_v36 = vsel %vm1777_vm2, %v1529_v61, 0.0  ;;  %v1279_v12 = vld [vmem:[%s4690_s0 + $0x298] sm:$0xff] }
 0x3f6   :  { %v1943_v59 = vadd.f32 %v1942_v13, %v3786_v29  ;;  %v1740_v57 = vadd.f32 %v1739_v35, %v3789_v34  ;;  %v1530_v41 = vmul.f32 %v1274_v33, %v4744_v6  ;;  %v1404_v29 = vld [vmem:[%s4690_s0 + $0x680] sm:$0xff]  ;;  %v1533_v37 = vmul.f32 %v1277_v4, %v4746_v25 }
 0x3f7   :  { %v2046_v55 = vadd.f32 %v3800_v56, %v2044_v39  ;;  %v1844_v20 = vadd.f32 %v3803_v38, %v1842_v15  ;;  %v4193_v2 = vpop.permute.xlu0 %1138  ;;  %v1276_v34 = vld [vmem:[%s4690_s0 + $0x280] sm:$0xff]  ;;  %v1661_v38 = vmul.f32 %v1405_v58, %v4745_v24  ;;  %v4215_v16 = vpop.permute.xlu1 %870  ;;  %v1660_v32 = vmul.f32 %v1404_v29, %v4745_v24  ;;  %v1411_v29 = vld [vmem:[%s4690_s0 + $0x6b8] sm:$0xff] }
 0x3f8   :  { %v1944_v47 = vadd.f32 %v1943_v59, %v3818_v30  ;;  %v1741_v56 = vadd.f32 %v1740_v57, %v3824_v49  ;;  %v2057_v30 = vsel %vm1777_vm2, %v1659_v22, 0.0  ;;  %v1855_v49 = vsel %vm1777_vm2, %v1531_v48, 0.0  ;;  %v4748_v39 = vld [vmem:[#allocation20_spill] sm:$0xff] }
 0x3f9   :  { %v2048_v42 = vadd.f32 %v3821_v31, %v2046_v55  ;;  %v1846_v61 = vadd.f32 %v3827_v0, %v1844_v20  ;;  %v1532_v13 = vmul.f32 %v1276_v34, %v4746_v25  ;;  %v1406_v31 = vld [vmem:[%s4690_s0 + $0x690] sm:$0xff]  ;;  %v1535_v15 = vmul.f32 %v1279_v12, %v4748_v39  ;;  %v1281_v22 = vld [vmem:[%s4690_s0 + $0x2a8] sm:$0xff]  ;;  %v1408_v55 = vld [vmem:[%s4690_s0 + $0x6a0] sm:$0xff] }
 0x3fa   :  { %v1945_v19 = vadd.f32 %v1944_v47, %v3836_v40  ;;  %v1742_v28 = vadd.f32 %v1741_v56, %v3878_v10  ;;  %v1278_v0 = vld [vmem:[%s4690_s0 + $0x290] sm:$0xff]  ;;  %v4747_v40 = vld [vmem:[#allocation19_spill] sm:$0xff]  ;;  %v1857_v48 = vsel %vm1777_vm2, %v1533_v37, 0.0 }
 0x3fb   :  { %v2050_v35 = vadd.f32 %v3924_v27, %v2048_v42  ;;  %v1848_v26 = vadd.f32 %v3927_v53, %v1846_v61  ;;  %v4231_v33 = vpop.permute.xlu0 %1142  ;;  %v1663_v10 = vmul.f32 %v1407_v23, %v4747_v40  ;;  %v2059_v53 = vsel %vm1777_vm2, %v1661_v38, 0.0  ;;  %v1283_v34 = vld [vmem:[%s4690_s0 + $0x2b8] sm:$0xff]  ;;  %v4267_v24 = vpop.permute.xlu1 %874 }
 0x3fc   :  { %v1946_v6 = vadd.f32 %v1945_v19, %v3970_v11  ;;  %v1743_v27 = vadd.f32 %v1742_v28, %v4015_v52  ;;  %v1662_v59 = vmul.f32 %v1406_v31, %v4747_v40  ;;  %v1534_v57 = vmul.f32 %v1278_v0, %v4748_v39  ;;  %v1280_v11 = vld [vmem:[%s4690_s0 + $0x2a0] sm:$0xff]  ;;  %v4749_v19 = vld [vmem:[#allocation21_spill] sm:$0xff]  ;;  %v4750_v31 = vld [vmem:[#allocation22_spill] sm:$0xff] }
 0x3fd   :  { %v2052_v58 = vadd.f32 %v4048_v5, %v2050_v35  ;;  %v1850_v4 = vadd.f32 %v4051_v7, %v1848_v26  ;;  %v1665_v5 = vmul.f32 %v1409_v51, %v3407_v45  ;;  %v1537_v7 = vmul.f32 %v1281_v22, %v3409_v44 }
 0x3fe   :  { %v1947_v52 = vadd.f32 %v1946_v6, %v4132_v8  ;;  %v1744_v20 = vadd.f32 %v1743_v27, %v4135_v43  ;;  %v2061_v43 = vsel %vm1777_vm2, %v1663_v10, 0.0  ;;  %v1859_v38 = vsel %vm1777_vm2, %v1535_v15, 0.0  ;;  %v1412_v15 = vld [vmem:[%s4690_s0 + $0x6c0] sm:$0xff]  ;;  %v1287_v6 = vld [vmem:[%s4690_s0 + $0x2d8] sm:$0xff] }
 0x3ff   :  { %v2054_v47 = vadd.f32 %v4158_v50, %v2052_v58  ;;  %v1852_v56 = vadd.f32 %v4161_v18, %v1850_v4  ;;  %v4269_v8 = vpop.permute.xlu0 %1146  ;;  %v1664_v23 = vmul.f32 %v1408_v55, %v3407_v45  ;;  %v1536_v12 = vmul.f32 %v1280_v11, %v3409_v44  ;;  %v1410_v50 = vld [vmem:[%s4690_s0 + $0x6b0] sm:$0xff]  ;;  %v1413_v45 = vld [vmem:[%s4690_s0 + $0x6c8] sm:$0xff]  ;;  %v4311_v4 = vpop.permute.xlu1 %878 }
 0x400   :  { %v1948_v25 = vadd.f32 %v1947_v52, %v4166_v21  ;;  %v1745_v37 = vadd.f32 %v1744_v20, %v4169_v9  ;;  %v1282_v18 = vld [vmem:[%s4690_s0 + $0x2b0] sm:$0xff]  ;;  %v1667_v28 = vmul.f32 %v1411_v29, %v4749_v19  ;;  %v1539_v21 = vmul.f32 %v1283_v34, %v4750_v31  ;;  %v1285_v44 = vld [vmem:[%s4690_s0 + $0x2c8] sm:$0xff] }
 0x401   :  { %v2056_v42 = vadd.f32 %v2055_v62, %v2054_v47  ;;  %v1854_v61 = vadd.f32 %v1853_v36, %v1852_v56  ;;  %v2063_v35 = vsel %vm1777_vm2, %v1665_v5, 0.0  ;;  %v1861_v26 = vsel %vm1777_vm2, %v1537_v7, 0.0  ;;  %v1414_v5 = vld [vmem:[%s4690_s0 + $0x6d0] sm:$0xff] }
 0x402   :  { %v1949_v9 = vadd.f32 %v1948_v25, %v1658_v46  ;;  %v1746_v0 = vadd.f32 %v1745_v37, %v1530_v41  ;;  %v1666_v10 = vmul.f32 %v1410_v50, %v4749_v19  ;;  %v1538_v39 = vmul.f32 %v1282_v18, %v4750_v31  ;;  %v1284_v46 = vld [vmem:[%s4690_s0 + $0x2c0] sm:$0xff]  ;;  %v1419_v18 = vld [vmem:[%s4690_s0 + $0x6f8] sm:$0xff] }
 0x403   :  { %v2058_v62 = vadd.f32 %v2057_v30, %v2056_v42  ;;  %v1856_v36 = vadd.f32 %v1855_v49, %v1854_v61  ;;  %v4293_v40 = vpop.permute.xlu0 %1150  ;;  %v1669_v22 = vmul.f32 %v1413_v45, %v3480_v14  ;;  %v1541_v30 = vmul.f32 %v1285_v44, %v3482_v1  ;;  %v1415_v49 = vld [vmem:[%s4690_s0 + $0x6d8] sm:$0xff]  ;;  %v1416_v61 = vld [vmem:[%s4690_s0 + $0x6e0] sm:$0xff]  ;;  %v4351_v45 = vpop.permute.xlu1 %882 }
 0x404   :  { %v1950_v41 = vadd.f32 %v1949_v9, %v1660_v32  ;;  %v1747_v51 = vadd.f32 %v1746_v0, %v1532_v13  ;;  %v2065_v55 = vsel %vm1777_vm2, %v1667_v28, 0.0  ;;  %v1863_v32 = vsel %vm1777_vm2, %v1539_v21, 0.0  ;;  %v1291_v42 = vld [vmem:[%s4690_s0 + $0x2f8] sm:$0xff] }
 0x405   :  { %v2060_v27 = vadd.f32 %v2059_v53, %v2058_v62  ;;  %v1858_v58 = vadd.f32 %v1857_v48, %v1856_v36  ;;  %v1668_v52 = vmul.f32 %v1412_v15, %v3480_v14  ;;  %v1540_v20 = vmul.f32 %v1284_v46, %v3482_v1  ;;  %v1286_v53 = vld [vmem:[%s4690_s0 + $0x2d0] sm:$0xff]  ;;  %v1417_v14 = vld [vmem:[%s4690_s0 + $0x6e8] sm:$0xff] }
 0x406   :  { %v1951_v13 = vadd.f32 %v1950_v41, %v1662_v59  ;;  %v1748_v11 = vadd.f32 %v1747_v51, %v1534_v57  ;;  %v1671_v34 = vmul.f32 %v1415_v49, %v3513_v17  ;;  %v1543_v59 = vmul.f32 %v1287_v6, %v3515_v60  ;;  %v1289_v1 = vld [vmem:[%s4690_s0 + $0x2e8] sm:$0xff]  ;;  %v1418_v62 = vld [vmem:[%s4690_s0 + $0x6f0] sm:$0xff] }
 0x407   :  { %v2062_v48 = vadd.f32 %v2061_v43, %v2060_v27  ;;  %v1860_v7 = vadd.f32 %v1859_v38, %v1858_v58  ;;  %v4323_v29 = vpop.permute.xlu0 %1154  ;;  %v2067_v56 = vsel %vm1777_vm2, %v1669_v22, 0.0  ;;  %v1865_v43 = vsel %vm1777_vm2, %v1541_v30, 0.0  ;;  %v4752_v36 = vld [vmem:[#allocation24_spill] sm:$0xff]  ;;  %v4753_v15 = vld [vmem:[#allocation25_spill] sm:$0xff] }
 0x408   :  { %v1952_v57 = vadd.f32 %v1951_v13, %v1664_v23  ;;  %v1749_v47 = vadd.f32 %v1748_v11, %v1536_v12  ;;  %v1670_v37 = vmul.f32 %v1414_v5, %v3513_v17  ;;  %v1542_v50 = vmul.f32 %v1286_v53, %v3515_v60  ;;  %v1288_v17 = vld [vmem:[%s4690_s0 + $0x2e0] sm:$0xff]  ;;  %v1293_v13 = vld [vmem:[%s4690_s0 + $0x308] sm:$0xff] }
 0x409   :  { %v2064_v38 = vadd.f32 %v2063_v35, %v2062_v48  ;;  %v1862_v25 = vadd.f32 %v1861_v26, %v1860_v7  ;;  %v1673_v19 = vmul.f32 %v1417_v14, %v3545_v54  ;;  %v4751_v60 = vld [vmem:[#allocation23_spill] sm:$0xff]  ;;  %v2069_v9 = vsel %vm1777_vm2, %v1671_v34, 0.0  ;;  %v4382_v14 = vpop.permute.xlu1 %886 }
 0x40a   :  { %v1953_v23 = vadd.f32 %v1952_v57, %v1666_v10  ;;  %v1750_v12 = vadd.f32 %v1749_v47, %v1538_v39  ;;  %v1545_v28 = vmul.f32 %v1289_v1, %v4751_v60  ;;  %v1867_v0 = vsel %vm1777_vm2, %v1543_v59, 0.0  ;;  %v1290_v39 = vld [vmem:[%s4690_s0 + $0x2f0] sm:$0xff]  ;;  %v1420_v7 = vld [vmem:[%s4690_s0 + $0x700] sm:$0xff] }
 0x40b   :  { %v2066_v31 = vadd.f32 %v2065_v55, %v2064_v38  ;;  %v1864_v21 = vadd.f32 %v1863_v32, %v1862_v25  ;;  %v4353_v44 = vpop.permute.xlu0 %1158  ;;  %v1675_v10 = vmul.f32 %v1419_v18, %v4752_v36  ;;  %v1547_v46 = vmul.f32 %v1291_v42, %v4753_v15  ;;  %v1421_v55 = vld [vmem:[%s4690_s0 + $0x708] sm:$0xff]  ;;  %v1423_v25 = vld [vmem:[%s4690_s0 + $0x718] sm:$0xff] }
 0x40c   :  { %v1954_v35 = vadd.f32 %v1953_v23, %v1668_v52  ;;  %v1751_v26 = vadd.f32 %v1750_v12, %v1540_v20  ;;  %v1672_v22 = vmul.f32 %v1416_v61, %v3545_v54  ;;  %v1544_v30 = vmul.f32 %v1288_v17, %v4751_v60  ;;  %v1295_v18 = vld [vmem:[%s4690_s0 + $0x318] sm:$0xff]  ;;  %v1422_v12 = vld [vmem:[%s4690_s0 + $0x710] sm:$0xff] }
 0x40d   :  { %v2068_v41 = vadd.f32 %v2067_v56, %v2066_v31  ;;  %v1866_v51 = vadd.f32 %v1865_v43, %v1864_v21  ;;  %v2071_v27 = vsel %vm1777_vm2, %v1673_v19, 0.0  ;;  %v1869_v58 = vsel %vm1777_vm2, %v1545_v28, 0.0  ;;  %v1292_v56 = vld [vmem:[%s4690_s0 + $0x300] sm:$0xff]  ;;  %v1294_v28 = vld [vmem:[%s4690_s0 + $0x310] sm:$0xff] }
 0x40e   :  { %v1955_v49 = vadd.f32 %v1954_v35, %v1670_v37  ;;  %v1752_v6 = vadd.f32 %v1751_v26, %v1542_v50  ;;  %v1674_v54 = vmul.f32 %v1418_v62, %v4752_v36  ;;  %v1546_v52 = vmul.f32 %v1290_v39, %v4753_v15  ;;  %v4415_v35 = vpop.permute.xlu1 %890  ;;  %v1424_v39 = vld [vmem:[%s4690_s0 + $0x720] sm:$0xff] }
 0x40f   :  { %v2070_v32 = vadd.f32 %v2069_v9, %v2068_v41  ;;  %v1868_v11 = vadd.f32 %v1867_v0, %v1866_v51  ;;  %v2073_v53 = vsel %vm1777_vm2, %v1675_v10, 0.0  ;;  %v1871_v48 = vsel %vm1777_vm2, %v1547_v46, 0.0  ;;  %v4384_v1 = vpop.permute.xlu0 %1162  ;;  %v1425_v9 = vld [vmem:[%s4690_s0 + $0x728] sm:$0xff]  ;;  %v1296_v51 = vld [vmem:[%s4690_s0 + $0x320] sm:$0xff] }
 0x410   :  { %v1956_v20 = vadd.f32 %v1955_v49, %v1672_v22  ;;  %v1753_v5 = vadd.f32 %v1752_v6, %v1544_v30  ;;  %v1677_v47 = vmul.f32 %v1421_v55, %v4153_v3  ;;  %v1549_v38 = vmul.f32 %v1293_v13, %v4155_v63  ;;  %v1297_v0 = vld [vmem:[%s4690_s0 + $0x328] sm:$0xff]  ;;  %v1299_v6 = vld [vmem:[%s4690_s0 + $0x338] sm:$0xff]  ;;  %v1426_v55 = vld [vmem:[%s4690_s0 + $0x730] sm:$0xff] }
 0x411   :  { %v2072_v34 = vadd.f32 %v2071_v27, %v2070_v32  ;;  %v1870_v59 = vadd.f32 %v1869_v58, %v1868_v11  ;;  %v1676_v42 = vmul.f32 %v1420_v7, %v4153_v3  ;;  %v1548_v23 = vmul.f32 %v1292_v56, %v4155_v63  ;;  %v1429_v7 = vld [vmem:[%s4690_s0 + $0x748] sm:$0xff]  ;;  %v1428_v56 = vld [vmem:[%s4690_s0 + $0x740] sm:$0xff] }
 0x412   :  { %v1957_v57 = vadd.f32 %v1956_v20, %v1674_v54  ;;  %v1754_v43 = vadd.f32 %v1753_v5, %v1546_v52  ;;  %v1679_v61 = vmul.f32 %v1423_v25, %v4193_v2  ;;  %v2075_v17 = vsel %vm1777_vm2, %v1677_v47, 0.0  ;;  %v4443_v13 = vpop.permute.xlu1 %894 }
 0x413   :  { %v2074_v37 = vadd.f32 %v2073_v53, %v2072_v34  ;;  %v1872_v50 = vadd.f32 %v1871_v48, %v1870_v59  ;;  %v1873_v60 = vsel %vm1777_vm2, %v1549_v38, 0.0  ;;  %v1551_v31 = vmul.f32 %v1295_v18, %v4215_v16  ;;  %v4417_v26 = vpop.permute.xlu0 %1166  ;;  %v1301_v34 = vld [vmem:[%s4690_s0 + $0x348] sm:$0xff] }
 0x414   :  { %v1958_v19 = vadd.f32 %v1957_v57, %v1676_v42  ;;  %v1755_v21 = vadd.f32 %v1754_v43, %v1548_v23  ;;  %v1678_v62 = vmul.f32 %v1422_v12, %v4193_v2  ;;  %v2077_v36 = vsel %vm1777_vm2, %v1679_v61, 0.0  ;;  %v1427_v2 = vld [vmem:[%s4690_s0 + $0x738] sm:$0xff] }
 0x415   :  { %v2076_v3 = vadd.f32 %v2075_v17, %v2074_v37  ;;  %v1874_v63 = vadd.f32 %v1873_v60, %v1872_v50  ;;  %v1550_v10 = vmul.f32 %v1294_v28, %v4215_v16  ;;  %v1875_v46 = vsel %vm1777_vm2, %v1551_v31, 0.0  ;;  %v1300_v37 = vld [vmem:[%s4690_s0 + $0x340] sm:$0xff]  ;;  %v1303_v23 = vld [vmem:[%s4690_s0 + $0x358] sm:$0xff]  ;;  %v1430_v60 = vld [vmem:[%s4690_s0 + $0x750] sm:$0xff] }
 0x416   :  { %v1959_v15 = vadd.f32 %v1958_v19, %v1678_v62  ;;  %v1681_v41 = vmul.f32 %v1425_v9, %v4231_v33  ;;  %v1553_v22 = vmul.f32 %v1297_v0, %v4267_v24  ;;  %v1680_v27 = vmul.f32 %v1424_v39, %v4231_v33  ;;  %v1298_v33 = vld [vmem:[%s4690_s0 + $0x330] sm:$0xff]  ;;  %v4477_v12 = vpop.permute.xlu1 %898  ;;  %v1433_v62 = vld [vmem:[%s4690_s0 + $0x768] sm:$0xff] }
 0x417   :  { %v2078_v16 = vadd.f32 %v2077_v36, %v2076_v3  ;;  %v1756_v30 = vadd.f32 %v1755_v21, %v1550_v10  ;;  %v1876_v49 = vadd.f32 %v1875_v46, %v1874_v63  ;;  %v1552_v58 = vmul.f32 %v1296_v51, %v4267_v24  ;;  %v4445_v11 = vpop.permute.xlu0 %1170  ;;  %v1302_v63 = vld [vmem:[%s4690_s0 + $0x350] sm:$0xff]  ;;  %v1305_v36 = vld [vmem:[%s4690_s0 + $0x368] sm:$0xff]  ;;  %v1432_v46 = vld [vmem:[%s4690_s0 + $0x760] sm:$0xff] }
 0x418   :  { %v1683_v32 = vmul.f32 %v1427_v2, %v4269_v8  ;;  %v1960_v54 = vadd.f32 %v1959_v15, %v1680_v27  ;;  %v2079_v52 = vsel %vm1777_vm2, %v1681_v41, 0.0  ;;  %v1877_v20 = vsel %vm1777_vm2, %v1553_v22, 0.0 }
 0x419   :  { %v1555_v24 = vmul.f32 %v1299_v6, %v4311_v4  ;;  %v2080_v5 = vadd.f32 %v2079_v52, %v2078_v16  ;;  %v1757_v53 = vadd.f32 %v1756_v30, %v1552_v58  ;;  %v1878_v48 = vadd.f32 %v1877_v20, %v1876_v49  ;;  %v1307_v58 = vld [vmem:[%s4690_s0 + $0x378] sm:$0xff] }
 0x41a   :  { %v1682_v59 = vmul.f32 %v1426_v55, %v4269_v8  ;;  %v2081_v57 = vsel %vm1777_vm2, %v1683_v32, 0.0  ;;  %v1554_v47 = vmul.f32 %v1298_v33, %v4311_v4  ;;  %v1685_v25 = vmul.f32 %v1429_v7, %v4293_v40  ;;  %v1431_v8 = vld [vmem:[%s4690_s0 + $0x758] sm:$0xff]  ;;  %v903_v41 = vpop.permute.xlu1 %902  ;;  %v1437_v7 = vld [vmem:[%s4690_s0 + $0x788] sm:$0xff] }
 0x41b   :  { %v1879_v38 = vsel %vm1777_vm2, %v1555_v24, 0.0  ;;  %v1557_v50 = vmul.f32 %v1301_v34, %v4351_v45  ;;  %v2082_v4 = vadd.f32 %v2081_v57, %v2080_v5  ;;  %v4479_v61 = vpop.permute.xlu0 %1174  ;;  %v1684_v19 = vmul.f32 %v1428_v56, %v4293_v40  ;;  %v1306_v5 = vld [vmem:[%s4690_s0 + $0x370] sm:$0xff]  ;;  %v1309_v34 = vld [vmem:[%s4690_s0 + $0x388] sm:$0xff] }
 0x41c   :  { %v1961_v43 = vadd.f32 %v1960_v54, %v1682_v59  ;;  %v1758_v18 = vadd.f32 %v1757_v53, %v1554_v47  ;;  %v1880_v42 = vadd.f32 %v1879_v38, %v1878_v48  ;;  %v1556_v17 = vmul.f32 %v1300_v37, %v4351_v45  ;;  %v1434_v54 = vld [vmem:[%s4690_s0 + $0x770] sm:$0xff]  ;;  %v1436_v38 = vld [vmem:[%s4690_s0 + $0x780] sm:$0xff] }
 0x41d   :  { %v1687_v28 = vmul.f32 %v1431_v8, %v4323_v29  ;;  %v2083_v3 = vsel %vm1777_vm2, %v1685_v25, 0.0  ;;  %v1881_v21 = vsel %vm1777_vm2, %v1557_v50, 0.0  ;;  %v1559_v9 = vmul.f32 %v1303_v23, %v4382_v14  ;;  %v1308_v8 = vld [vmem:[%s4690_s0 + $0x380] sm:$0xff]  ;;  %v1311_v23 = vld [vmem:[%s4690_s0 + $0x398] sm:$0xff] }
 0x41e   :  { %v1962_v31 = vadd.f32 %v1961_v43, %v1684_v19  ;;  %v2084_v40 = vadd.f32 %v2083_v3, %v2082_v4  ;;  %v1759_v0 = vadd.f32 %v1758_v18, %v1556_v17  ;;  %v1882_v45 = vadd.f32 %v1881_v21, %v1880_v42  ;;  %v907_v59 = vpop.permute.xlu1 %906 }
 0x41f   :  { %v1686_v10 = vmul.f32 %v1430_v60, %v4323_v29  ;;  %v2085_v39 = vsel %vm1777_vm2, %v1687_v28, 0.0  ;;  %v1558_v15 = vmul.f32 %v1302_v63, %v4382_v14  ;;  %v4505_v51 = vpop.permute.xlu0 %1178  ;;  %v1883_v2 = vsel %vm1777_vm2, %v1559_v9, 0.0  ;;  %v1304_v29 = vld [vmem:[%s4690_s0 + $0x360] sm:$0xff]  ;;  %v1435_v14 = vld [vmem:[%s4690_s0 + $0x778] sm:$0xff]  ;;  %v1438_v60 = vld [vmem:[%s4690_s0 + $0x790] sm:$0xff] }
 0x420   :  { %v1689_v16 = vmul.f32 %v1433_v62, %v4353_v44  ;;  %v1561_v30 = vmul.f32 %v1305_v36, %v4415_v35  ;;  %v2086_v49 = vadd.f32 %v2085_v39, %v2084_v40  ;;  %v1884_v27 = vadd.f32 %v1883_v2, %v1882_v45  ;;  %v1441_v62 = vld [vmem:[%s4690_s0 + $0x7a8] sm:$0xff] }
 0x421   :  { %v1963_v22 = vadd.f32 %v1962_v31, %v1686_v10  ;;  %v1760_v6 = vadd.f32 %v1759_v0, %v1558_v15  ;;  %v1688_v55 = vmul.f32 %v1432_v46, %v4353_v44  ;;  %v1560_v32 = vmul.f32 %v1304_v29, %v4415_v35  ;;  %v1313_v36 = vld [vmem:[%s4690_s0 + $0x3a8] sm:$0xff]  ;;  %v1440_v46 = vld [vmem:[%s4690_s0 + $0x7a0] sm:$0xff] }
 0x422   :  { %v1691_v52 = vmul.f32 %v1435_v14, %v4384_v1  ;;  %v2087_v33 = vsel %vm1777_vm2, %v1689_v16, 0.0  ;;  %v1885_v24 = vsel %vm1777_vm2, %v1561_v30, 0.0  ;;  %v1563_v53 = vmul.f32 %v1307_v58, %v4443_v13  ;;  %v911_v31 = vpop.permute.xlu1 %910  ;;  %v1312_v29 = vld [vmem:[%s4690_s0 + $0x3a0] sm:$0xff] }
 0x423   :  { %v1964_v20 = vadd.f32 %v1963_v22, %v1688_v55  ;;  %v2088_v44 = vadd.f32 %v2087_v33, %v2086_v49  ;;  %v1761_v48 = vadd.f32 %v1760_v6, %v1560_v32  ;;  %v1886_v35 = vadd.f32 %v1885_v24, %v1884_v27  ;;  %v4537_v57 = vpop.permute.xlu0 %1182  ;;  %v1315_v6 = vld [vmem:[%s4690_s0 + $0x3b8] sm:$0xff] }
 0x424   :  { %v1690_v47 = vmul.f32 %v1434_v54, %v4384_v1  ;;  %v2089_v56 = vsel %vm1777_vm2, %v1691_v52, 0.0  ;;  %v1562_v43 = vmul.f32 %v1306_v5, %v4443_v13  ;;  %v1887_v37 = vsel %vm1777_vm2, %v1563_v53, 0.0  ;;  %v1439_v1 = vld [vmem:[%s4690_s0 + $0x798] sm:$0xff]  ;;  %v1442_v54 = vld [vmem:[%s4690_s0 + $0x7b0] sm:$0xff] }
 0x425   :  { %v1693_v50 = vmul.f32 %v1437_v7, %v4417_v26  ;;  %v1565_v4 = vmul.f32 %v1309_v34, %v4477_v12  ;;  %v2090_v13 = vadd.f32 %v2089_v56, %v2088_v44  ;;  %v1888_v42 = vadd.f32 %v1887_v37, %v1886_v35  ;;  %v1314_v5 = vld [vmem:[%s4690_s0 + $0x3b0] sm:$0xff]  ;;  %v1445_v35 = vld [vmem:[%s4690_s0 + $0x7c8] sm:$0xff]  ;;  %v1444_v56 = vld [vmem:[%s4690_s0 + $0x7c0] sm:$0xff] }
 0x426   :  { %v1965_v25 = vadd.f32 %v1964_v20, %v1690_v47  ;;  %v1762_v18 = vadd.f32 %v1761_v48, %v1562_v43  ;;  %v1692_v19 = vmul.f32 %v1436_v38, %v4417_v26  ;;  %v1564_v17 = vmul.f32 %v1308_v8, %v4477_v12  ;;  %v1310_v26 = vld [vmem:[%s4690_s0 + $0x390] sm:$0xff]  ;;  %v915_v27 = vpop.permute.xlu1 %914  ;;  %v1317_v7 = vld [vmem:[%s4690_s0 + $0x3c8] sm:$0xff]  ;;  %v1316_v8 = vld [vmem:[%s4690_s0 + $0x3c0] sm:$0xff] }
 0x427   :  { %v1695_v28 = vmul.f32 %v1439_v1, %v4445_v11  ;;  %v4563_v3 = vpop.permute.xlu0 %1186  ;;  %v2091_v63 = vsel %vm1777_vm2, %v1693_v50, 0.0  ;;  %v1889_v9 = vsel %vm1777_vm2, %v1565_v4, 0.0  ;;  %v1567_v40 = vmul.f32 %v1311_v23, %v903_v41 }
 0x428   :  { %v1966_v21 = vadd.f32 %v1965_v25, %v1692_v19  ;;  %v2092_v12 = vadd.f32 %v2091_v63, %v2090_v13  ;;  %v1763_v0 = vadd.f32 %v1762_v18, %v1564_v17  ;;  %v1890_v45 = vadd.f32 %v1889_v9, %v1888_v42  ;;  %v1319_v42 = vld [vmem:[%s4690_s0 + $0x3d8] sm:$0xff]  ;;  %v1446_v17 = vld [vmem:[%s4690_s0 + $0x7d0] sm:$0xff] }
 0x429   :  { %v1694_v10 = vmul.f32 %v1438_v60, %v4445_v11  ;;  %v2093_v39 = vsel %vm1777_vm2, %v1695_v28, 0.0  ;;  %v1566_v15 = vmul.f32 %v1310_v26, %v903_v41  ;;  %v1891_v2 = vsel %vm1777_vm2, %v1567_v40, 0.0  ;;  %v1443_v11 = vld [vmem:[%s4690_s0 + $0x7b8] sm:$0xff]  ;;  %v1318_v63 = vld [vmem:[%s4690_s0 + $0x3d0] sm:$0xff] }
 0x42a   :  { %v1697_v16 = vmul.f32 %v1441_v62, %v4479_v61  ;;  %v1569_v30 = vmul.f32 %v1313_v36, %v907_v59  ;;  %v2094_v14 = vadd.f32 %v2093_v39, %v2092_v12  ;;  %v1892_v49 = vadd.f32 %v1891_v2, %v1890_v45  ;;  %v919_v43 = vpop.permute.xlu1 %918  ;;  %v1323_v62 = vld [vmem:[%s4690_s0 + $0x3f8] sm:$0xff] }
 0x42b   :  { %v1967_v22 = vadd.f32 %v1966_v21, %v1694_v10  ;;  %v1764_v41 = vadd.f32 %v1763_v0, %v1566_v15  ;;  %v4592_v58 = vpop.permute.xlu0 %1190  ;;  %v1696_v55 = vmul.f32 %v1440_v46, %v4479_v61  ;;  %v1568_v32 = vmul.f32 %v1312_v29, %v907_v59  ;;  %v1321_v0 = vld [vmem:[%s4690_s0 + $0x3e8] sm:$0xff]  ;;  %v1448_v46 = vld [vmem:[%s4690_s0 + $0x7e0] sm:$0xff]  ;;  %v1451_v2 = vld [vmem:[%s4690_s0 + $0x7f8] sm:$0xff] }
 0x42c   :  { %v1699_v52 = vmul.f32 %v1443_v11, %v4505_v51  ;;  %v2095_v33 = vsel %vm1777_vm2, %v1697_v16, 0.0  ;;  %v1893_v24 = vsel %vm1777_vm2, %v1569_v30, 0.0  ;;  %v1571_v53 = vmul.f32 %v1315_v6, %v911_v31  ;;  %v1322_v11 = vld [vmem:[%s4690_s0 + $0x3f0] sm:$0xff] }
 0x42d   :  { %v1968_v20 = vadd.f32 %v1967_v22, %v1696_v55  ;;  %v2096_v44 = vadd.f32 %v2095_v33, %v2094_v14  ;;  %v1765_v48 = vadd.f32 %v1764_v41, %v1568_v32  ;;  %v1894_v61 = vadd.f32 %v1893_v24, %v1892_v49 }
 0x42e   :  { %v1698_v34 = vmul.f32 %v1442_v54, %v4505_v51  ;;  %v2097_v59 = vsel %vm1777_vm2, %v1699_v52, 0.0  ;;  %v1570_v47 = vmul.f32 %v1314_v5, %v911_v31  ;;  %v1895_v37 = vsel %vm1777_vm2, %v1571_v53, 0.0  ;;  %v1447_v51 = vld [vmem:[%s4690_s0 + $0x7d8] sm:$0xff]  ;;  %v923_v45 = vpop.permute.xlu1 %922 }
 0x42f   :  { %v1195_v38 = vpop.permute.xlu0 %1194  ;;  %v1701_v50 = vmul.f32 %v1445_v35, %v4537_v57  ;;  %v1573_v4 = vmul.f32 %v1317_v7, %v915_v27  ;;  %v2098_v1 = vadd.f32 %v2097_v59, %v2096_v44  ;;  %v1896_v18 = vadd.f32 %v1895_v37, %v1894_v61 }
 0x430   :  { %v1969_v25 = vadd.f32 %v1968_v20, %v1698_v34  ;;  %v1766_v13 = vadd.f32 %v1765_v48, %v1570_v47  ;;  %v1700_v23 = vmul.f32 %v1444_v56, %v4537_v57  ;;  %v1572_v19 = vmul.f32 %v1316_v8, %v915_v27  ;;  %v1449_v57 = vld [vmem:[%s4690_s0 + $0x7e8] sm:$0xff]  ;;  %v1450_v27 = vld [vmem:[%s4690_s0 + $0x7f0] sm:$0xff] }
 0x431   :  { %v1703_v60 = vmul.f32 %v1447_v51, %v4563_v3  ;;  %v2099_v31 = vsel %vm1777_vm2, %v1701_v50, 0.0  ;;  %v1897_v21 = vsel %vm1777_vm2, %v1573_v4, 0.0  ;;  %v1575_v9 = vmul.f32 %v1319_v42, %v919_v43 }
 0x432   :  { %v1970_v28 = vadd.f32 %v1969_v25, %v1700_v23  ;;  %v2100_v26 = vadd.f32 %v2099_v31, %v2098_v1  ;;  %v1767_v40 = vadd.f32 %v1766_v13, %v1572_v19  ;;  %v1898_v12 = vadd.f32 %v1897_v21, %v1896_v18 }
 0x433   :  { %v927_v36 = vpop.permute.xlu0 %926  ;;  %v1702_v10 = vmul.f32 %v1446_v17, %v4563_v3  ;;  %v2101_v39 = vsel %vm1777_vm2, %v1703_v60, 0.0  ;;  %v1574_v15 = vmul.f32 %v1318_v63, %v919_v43  ;;  %v1705_v22 = vmul.f32 %v1449_v57, %v4592_v58  ;;  %v1320_v3 = vld [vmem:[%s4690_s0 + $0x3e0] sm:$0xff]  ;;  %s2121_s0 = sld [smem:[#allocation2]] }
 0x434   :  { %v1899_v29 = vsel %vm1777_vm2, %v1575_v9, 0.0  ;;  %v1577_v30 = vmul.f32 %v1321_v0, %v923_v45  ;;  %v1579_v14 = vmul.f32 %v1323_v62, %v927_v36  ;;  %v2102_v41 = vadd.f32 %v2101_v39, %v2100_v26 }
 0x435   :  { %v1971_v16 = vadd.f32 %v1970_v28, %v1702_v10  ;;  %v1768_v49 = vadd.f32 %v1767_v40, %v1574_v15  ;;  %v1900_v6 = vadd.f32 %v1899_v29, %v1898_v12  ;;  %v1704_v55 = vmul.f32 %v1448_v46, %v4592_v58 }
 0x436   :  { %v1707_v32 = vmul.f32 %v1451_v2, %v1195_v38  ;;  %v2103_v54 = vsel %vm1777_vm2, %v1705_v22, 0.0  ;;  %v1576_v52 = vmul.f32 %v1320_v3, %v923_v45  ;;  %v1578_v20 = vmul.f32 %v1322_v11, %v927_v36 }
 0x437   :  { %v1972_v33 = vadd.f32 %v1971_v16, %v1704_v55  ;;  %v1901_v24 = vsel %vm1777_vm2, %v1577_v30, 0.0  ;;  %v1706_v5 = vmul.f32 %v1450_v27, %v1195_v38  ;;  %v1903_v53 = vsel %vm1777_vm2, %v1579_v14, 0.0 }
 0x438   :  { %v2104_v44 = vadd.f32 %v2103_v54, %v2102_v41  ;;  %v1769_v48 = vadd.f32 %v1768_v49, %v1576_v52  ;;  %v1902_v61 = vadd.f32 %v1901_v24, %v1900_v6  ;;  %v2105_v35 = vsel %vm1777_vm2, %v1707_v32, 0.0 }
 0x439   :  { %v1973_v59 = vadd.f32 %v1972_v33, %v1706_v5  ;;  %v2123_v57 = vstv %s2121_s0  ;;  %v2128_v62 = vstv %s2229_s12  ;;  %v2572_v33 = vmov 1983009808  }
 0x43a   :  { %v1770_v7 = vadd.f32 %v1769_v48, %v1578_v20  ;;  %v1904_v34 = vadd.f32 %v1903_v53, %v1902_v61  ;;  %v2106_v58 = vadd.f32 %v2105_v35, %v2104_v44  ;;  %v2163_v24 = vunpack.c.l.s4 %v2572_v33 }
 0x43b   :  { %v1974_v43 = vrot.slane %v1973_v59, 4 }
 0x43c   :  { %v1771_v47 = vrot.slane %v1770_v7, 4  ;;  %v1905_v56 = vrot.slane %v1904_v34, 4  ;;  %v2107_v25 = vrot.slane %v2106_v58, 4  ;;  %v2164_v53 = vunpack.c.0.s8 %v2163_v24 }
 0x43d   :  { %v1975_v8 = vadd.f32 %v1974_v43, %v1973_v59  ;;  %v4754_v59 = vld [vmem:[#allocation8_spill] sm:$0xff] }
 0x43e   :  { %v1772_v37 = vadd.f32 %v1771_v47, %v1770_v7  ;;  %v1906_v50 = vadd.f32 %v1905_v56, %v1904_v34  ;;  %v2108_v4 = vadd.f32 %v2107_v25, %v2106_v58  ;;  %v2167_v58 = vsub.s32 %v2164_v53, %v4754_v59 }
 0x43f   :  { %v1976_v1 = vrot.slane %v1975_v8, 2 }
 0x440   :  { %v1773_v38 = vrot.slane %v1772_v37, 2  ;;  %v1907_v51 = vrot.slane %v1906_v50, 2  ;;  %v2109_v13 = vrot.slane %v2108_v4, 2 }
 0x441   :  { %v1977_v23 = vadd.f32 %v1976_v1, %v1975_v8 }
 0x442   :  { %v1774_v18 = vadd.f32 %v1773_v38, %v1772_v37  ;;  %v1908_v42 = vadd.f32 %v1907_v51, %v1906_v50  ;;  %v2110_v19 = vadd.f32 %v2109_v13, %v2108_v4 }
 0x443   :  { %v1978_v28 = vrot.slane %v1977_v23, 1 }
 0x444   :  { %v1775_v17 = vrot.slane %v1774_v18, 1  ;;  %v1909_v60 = vrot.slane %v1908_v42, 1  ;;  %v2111_v31 = vrot.slane %v2110_v19, 1 }
 0x445   :  { %v1979_v9 = vadd.f32 %v1978_v28, %v1977_v23 }
 0x446   :  { %v1776_v21 = vadd.f32 %v1775_v17, %v1774_v18  ;;  %v1910_v63 = vadd.f32 %v1909_v60, %v1908_v42  ;;  %v2112_v40 = vadd.f32 %v2111_v31, %v2110_v19 }
 0x46a   :  { %v659_v26 = vpop.xlane.xlu1 %658 }
 0x46b   :  { %v2114_v12 = vrot.slane %v659_v26, 1  ;;  %v2117_v0 = vadd.f32 %v1776_v21, %v659_v26  ;;  %v2118_v45 = vadd.f32 %v1910_v63, %v659_v26 }
 0x46d   :  { %v2119_v36 = vadd.f32 %v2114_v12, %v1979_v9  ;;  %v2120_v10 = vadd.f32 %v2114_v12, %v2112_v40  ;;  %v2124_v39 = vmul.f32 %v2123_v57, %v2117_v0  ;;  %v2125_v15 = vmul.f32 %v2123_v57, %v2118_v45 }
 0x46f   :  { %v2126_v46 = vmul.f32 %v2123_v57, %v2119_v36  ;;  %v2127_v22 = vmul.f32 %v2123_v57, %v2120_v10  ;;  %v2129_v2 = vadd.f32 %v2128_v62, %v2124_v39  ;;  %v2130_v16 = vadd.f32 %v2128_v62, %v2125_v15 }
 0x471   :  { %v2131_v29 = vadd.f32 %v2128_v62, %v2126_v46  ;;  %v2132_v3 = vadd.f32 %v2128_v62, %v2127_v22  ;;  %v2230_v30 = vmul.f32 -1.442695, %v2129_v2  ;;  %v2231_v11 = vmul.f32 -1.442695, %v2130_v16 }
 0x473   :  { %2514 = vpow2.f32 %v2230_v30  ;;  %v2232_v14 = vmul.f32 -1.442695, %v2131_v29  ;;  %v2233_v41 = vmul.f32 -1.442695, %v2132_v3 }
 0x474   :  { %2516 = vpow2.f32 %v2231_v11 }
 0x475   :  { %2518 = vpow2.f32 %v2232_v14 }
 0x476   :  { %2520 = vpow2.f32 %v2233_v41 }
 0x47d   :  { %v2515_v49 = vpop.eup %2514 }
 0x47e   :  { %v2517_v6 = vpop.eup %2516  ;;  %v2145_v27 = vadd.f32 1.0, %v2515_v49 }
 0x47f   :  { %v2519_v55 = vpop.eup %2518  ;;  %v2146_v32 = vadd.f32 1.0, %v2517_v6 }
 0x480   :  { %v2521_v54 = vpop.eup %2520  ;;  %v2147_v52 = vadd.f32 1.0, %v2519_v55  ;;  %2522 = vrcp.f32 %v2145_v27 }
 0x481   :  { %v2148_v20 = vadd.f32 1.0, %v2521_v54  ;;  %2524 = vrcp.f32 %v2146_v32 }
 0x482   :  { %2526 = vrcp.f32 %v2147_v52 }
 0x483   :  { %2528 = vrcp.f32 %v2148_v20 }
 0x48a   :  { %v2523_v5 = vpop.eup %2522 }
 0x48b   :  { %v2525_v44 = vpop.eup %2524 }
 0x48c   :  { %v2527_v48 = vpop.eup %2526  ;;  %v2161_v61 = vcombine.low %v2523_v5, %v2525_v44 }
 0x48d   :  { %v2529_v35 = vpop.eup %2528  ;;  %v2193_v7 = vrot.slane %v2527_v48, 7 }
 0x48e   :  { %v2195_v34 = vrot.slane %v2529_v35, 7  ;;  %v2169_v47 = vcombine.low %v2527_v48, %v2529_v35  ;;  %v2168_v4 = vrot.slane %v2161_v61, %v2167_v58 }
 0x48f   :  { %v2194_v56 = vsel %vm199_vm0, %v2193_v7, %v2523_v5 }
 0x490   :  { %v2196_v43 = vsel %vm199_vm0, %v2195_v34, %v2525_v44  ;;  %v2199_v25 = vsel %vm656_vm3, %v2194_v56, -inf  ;;  %v2176_v37 = vrot.slane %v2169_v47, %v2167_v58 }
 0x491   :  { %v2201_v50 = vsel %vm2200_vm4, %v2196_v43, -inf }
 0x492   :  { %v2202_v8 = vmax.f32 %v2199_v25, %v2201_v50  ;;  %v2181_v38 = vrot.slane %v2176_v37, 7 }
 0x494   :  { %2203 = vmax.xlane.f32.xlu0 %v2202_v8  ;;  %v2182_v51 = vsel %vm199_vm0, %v2181_v38, %v2168_v4 }
 0x495   :  { %v2184_v1 = vsel %vm2183_vm5, %v2181_v38, %v2182_v51 }
 0x496   :  { %v2186_v13 = vsel %vm2185_vm7, %v2181_v38, %v2184_v1 }
 0x497   :  { %v2188_v18 = vsel %vm2187_vm8, %v2181_v38, %v2186_v13 }
 0x498   :  { %2192 = vst.msk [vmem:[#allocation5] sm:$0xf] %vm2191_vm9, %v2188_v18 }
 0x499   :  { %2553 = shalt.err (!%p2550_p9)
}
 0x49a   :  { %s2554_s17 = scalar_lea.hbm %s4700_s10, 64 }
 0x49b   :  { %p2555_p10 = scmp.ne.s32.totalorder %s4700_s10, %s2554_s17  ;;  %p2558_p11 = scmp.lt.u32.totalorder %s2554_s17, %s4700_s10 }
 0x49d   :  { %p2560_p12 = pnand %p2558_p11, %p2555_p10 }
 0x49f   :  { %2563 = shalt.err (!%p2560_p12)
}
 0x4a0   :  { %2218 = dma.vmem_to_hbm [thread:$0]  %s2216_s14, 64, %s4700_s10, [#allocation3]   ;;  %vm2205_vm10 = vcmask 1024  }
 0x521   :  { %v2204_v42 = vpop.xlane.xlu0 %2203 }
 0x522   :  { %2206 = vst.msk [vmem:[%s4699_s9] sm:$0x3] %vm2205_vm10, %v2204_v42 }
 0x523   :  { %2566 = dma.done.wait [#allocation3], 64  }
 0x524   :  { %2567 = vsyncadd [#allocation3], 4294967232 }
 0x525   :  { %2224 = vsyncpa [#allocation3], 1 }
 0x526   :  { %2225 = vsyncpa [#allocation4], 1 }

</bundles_post_ra>
